<compile_context>
chip_gen: v7x
topology: tpu7x:2x2x1
jax: 0.10.0
libtpu: 0.0.40
codegen_flags: <defaults>
</compile_context>

<pallas_src>
import functools

import jax
import jax.numpy as jnp
from jax import lax
from jax.experimental import pallas as pl
from jax.experimental.pallas import tpu as pltpu

EPS = 1e-5


def _resnet_block_kernel(x_ref, w1_ref, b1_ref, w2_ref, b2_ref, out_ref, pad_ref,
                         *, H, W, off):
    """One image per grid step: out = x + IN(conv2(rpad(ReLU(IN(conv1(rpad(x)))))))."""
    _, C, HW = x_ref.shape
    Lp = (H + 2) * W
    total = pad_ref.shape[1]
    inv_n = 1.0 / HW

    # Hoisted column-reflect boundary masks, (1, HW) bool, broadcast over C.
    col = lax.broadcasted_iota(jnp.int32, (1, HW), 1) % W
    mask_l = col == 0
    mask_r = col == W - 1

    # Guard lanes are never selected by the masks; zero them once (scratch persists
    # across grid steps and write_padded only touches [off, off + Lp)).
    @pl.when(pl.program_id(0) == 0)
    def _():
        pad_ref[:, :off] = jnp.zeros((C, off), pad_ref.dtype)
        pad_ref[:, off + Lp:total] = jnp.zeros((C, total - off - Lp), pad_ref.dtype)

    def write_padded(y):
        # Row-reflect-padded image: padded row r, col w lives at lane off + r*W + w.
        # `off` is chosen so that off + W (bulk write / centre tap start) is a
        # multiple of 128 -> unmasked full-width stores for the big transfer.
        yc = y.astype(pad_ref.dtype)                       # single cast per conv input
        pad_ref[:, off:off + W] = yc[:, W:2 * W]           # top reflect = image row 1
        pad_ref[:, off + W:off + W + HW] = yc              # rows 0..H-1 (lane-aligned)
        pad_ref[:, off + (H + 1) * W:off + Lp] = yc[:, (H - 2) * W:(H - 1) * W]

    def conv3x3(w_ref, b_ref):
        # Prepare all 9 shifted (C, HW) operands first, then run 9 back-to-back
        # accumulating MXU dots (no selects/casts between consecutive dots).
        taps = []
        for dy in range(3):
            base = off + dy * W
            z0 = pad_ref[:, base - 1:base - 1 + HW]        # dx = -1 (pre column fix)
            z1 = pad_ref[:, base:base + HW]                # dx =  0
            z2 = pad_ref[:, base + 1:base + 1 + HW]        # dx = +1 (pre column fix)
            taps.append(jnp.where(mask_l, z2, z0))         # reflect at column 0
            taps.append(z1)
            taps.append(jnp.where(mask_r, z0, z2))         # reflect at column W-1
        acc = jnp.zeros((C, HW), jnp.float32)
        for k in range(9):
            acc = acc + jnp.dot(w_ref[k], taps[k],
                                preferred_element_type=jnp.float32)
        return acc + b_ref[...]                            # (C, 1) f32 bias broadcast

    def inorm(y):
        mean = jnp.sum(y, axis=1, keepdims=True) * inv_n
        ex2 = jnp.sum(y * y, axis=1, keepdims=True) * inv_n
        var = jnp.maximum(ex2 - mean * mean, 0.0)          # one-pass stats, clamped
        return (y - mean) * lax.rsqrt(var + EPS)

    x = x_ref[0].astype(jnp.float32)                       # (C, H*W)
    write_padded(x)
    y = jnp.maximum(inorm(conv3x3(w1_ref, b1_ref)), 0.0)   # conv1 -> IN -> ReLU
    write_padded(y)                                        # scratch fully overwritten
    y = inorm(conv3x3(w2_ref, b2_ref))                     # conv2 -> IN
    out_ref[0] = (x + y).astype(out_ref.dtype)             # residual add


def resnet_block_nchw(x_nchw, w1_oihw, b1, w2_oihw, b2, *,
                      compute_dtype=jnp.bfloat16, weight_buffers=1):
    """x: (N, C, H, W); conv weights in PyTorch OIHW (C, C, 3, 3); biases (C,)."""
    N, C, H, W = x_nchw.shape
    assert H >= 2 and W >= 2, "ReflectionPad2d(1) needs H >= 2 and W >= 2"
    HW = H * W

    # Scratch layout offset: padded (r, w) at lane off + r*W + w, with off >= 1 and
    # off + W a multiple of 128 (aligns the bulk write and the centre tap).
    off = (-W) % 128
    if off == 0:
        off = 128
    Lp = (H + 2) * W
    pad_lanes = pl.cdiv(off + Lp + 1, 128) * 128

    x_flat = x_nchw.reshape(N, C, HW)                      # NCHW kept, free reshape
    # Per-tap (C_out, C_in) matrices, k = dy*3 + dx; compute dtype for the MXU.
    w1_9 = jnp.transpose(w1_oihw, (2, 3, 0, 1)).reshape(9, C, C).astype(compute_dtype)
    w2_9 = jnp.transpose(w2_oihw, (2, 3, 0, 1)).reshape(9, C, C).astype(compute_dtype)
    b1c = b1.reshape(C, 1).astype(jnp.float32)
    b2c = b2.reshape(C, 1).astype(jnp.float32)

    kernel = functools.partial(_resnet_block_kernel, H=H, W=W, off=off)

    x_size = jnp.dtype(x_nchw.dtype).itemsize
    c_size = jnp.dtype(compute_dtype).itemsize

    # Grid-invariant weights/biases: a single VMEM buffer is enough.
    pm = {"pipeline_mode": pl.Buffered(weight_buffers)} if weight_buffers != 2 else {}
    w1_spec = pl.BlockSpec((9, C, C), lambda n: (0, 0, 0), **pm)
    b1_spec = pl.BlockSpec((C, 1), lambda n: (0, 0), **pm)
    w2_spec = pl.BlockSpec((9, C, C), lambda n: (0, 0, 0), **pm)
    b2_spec = pl.BlockSpec((C, 1), lambda n: (0, 0), **pm)

    # Per-step VMEM working set estimate (double-buffered in/out blocks, weights,
    # pad scratch, 9 tap operands + f32 temporaries) with headroom.
    est = (4 * C * HW * x_size
           + 2 * weight_buffers * (9 * C * C * c_size + C * 4)
           + C * pad_lanes * c_size
           + 9 * C * HW * c_size + 4 * C * HW * 4)
    vmem_limit = int(max(32 << 20, min(est * 5 // 4 + (4 << 20), 100 << 20)))

    cost = pl.CostEstimate(
        flops=2 * 2 * 9 * C * C * HW * N,                  # 2 convs x 9 taps x MACs
        transcendentals=2 * C * N,                         # per-channel rsqrt
        bytes_accessed=2 * N * C * HW * x_size + 2 * 9 * C * C * c_size + 2 * C * 4,
    )

    out_flat = pl.pallas_call(
        kernel,
        out_shape=jax.ShapeDtypeStruct((N, C, HW), x_nchw.dtype),
        grid=(N,),
        in_specs=[
            pl.BlockSpec((1, C, HW), lambda n: (n, 0, 0)),
            w1_spec, b1_spec, w2_spec, b2_spec,
        ],
        out_specs=pl.BlockSpec((1, C, HW), lambda n: (n, 0, 0)),
        scratch_shapes=[pltpu.VMEM((C, pad_lanes), compute_dtype)],
        compiler_params=pltpu.CompilerParams(
            # TODO(synk): on v7x verify "parallel" shards the batch over both
            # TensorCores; if not, switch to pltpu.CORE_PARALLEL / pl.core_map.
            dimension_semantics=("parallel",),
            vmem_limit_bytes=vmem_limit),
        cost_estimate=cost,
    )(x_flat, w1_9, b1c, w2_9, b2c)
    return out_flat.reshape(N, C, H, W)


# ---------------- pure-JAX reference (correctness check) ----------------
def ref_resnet_block_nchw(x, w1, b1, w2, b2):
    dn = ("NCHW", "OIHW", "NCHW")

    def conv(inp, w, b):
        p = jnp.pad(inp, ((0, 0), (0, 0), (1, 1), (1, 1)), mode="reflect")
        y = lax.conv_general_dilated(p, w, (1, 1), "VALID", dimension_numbers=dn)
        return y + b[None, :, None, None]

    def inorm(y):
        mean = jnp.mean(y, axis=(2, 3), keepdims=True)
        var = jnp.mean((y - mean) ** 2, axis=(2, 3), keepdims=True)
        return (y - mean) * lax.rsqrt(var + EPS)

    h = jnp.maximum(inorm(conv(x, w1, b1)), 0.0)
    h = inorm(conv(h, w2, b2))
    return x + h


def _run(x, w1, b1, w2, b2, **kw):
    try:
        fn = jax.jit(functools.partial(resnet_block_nchw, **kw))
        return jax.block_until_ready(fn(x, w1, b1, w2, b2))
    except Exception:
        # Fallback if this Pallas version rejects single-buffer pipeline_mode on
        # grid-invariant BlockSpecs: use default double-buffered weight specs.
        fn = jax.jit(functools.partial(resnet_block_nchw, weight_buffers=2, **kw))
        return jax.block_until_ready(fn(x, w1, b1, w2, b2))


if __name__ == "__main__":
    N, C, H, W = 2, 4, 16, 16  # dim = C = 4

    key = jax.random.PRNGKey(0)
    kx, kw1, kb1, kw2, kb2 = jax.random.split(key, 5)
    x = jax.random.normal(kx, (N, C, H, W), dtype=jnp.float32)
    # Conv2d(dim, dim, 3) parameters, PyTorch OIHW layout.
    w1 = jax.random.normal(kw1, (C, C, 3, 3), dtype=jnp.float32) * 0.1
    b1 = jax.random.normal(kb1, (C,), dtype=jnp.float32) * 0.1
    w2 = jax.random.normal(kw2, (C, C, 3, 3), dtype=jnp.float32) * 0.1
    b2 = jax.random.normal(kb2, (C,), dtype=jnp.float32) * 0.1

    ref = ref_resnet_block_nchw(x, w1, b1, w2, b2)

    # f32 MXU path: exactness check against the pure-JAX reference.
    out_f32 = _run(x, w1, b1, w2, b2, compute_dtype=jnp.float32)
    assert out_f32.shape == (N, C, H, W)
    assert jnp.allclose(out_f32, ref, atol=1e-4, rtol=1e-4), \
        f"f32 max err {jnp.max(jnp.abs(out_f32 - ref))}"

    # Default bf16-MXU path (production config); loose tolerance because the MXU
    # operands are rounded to bf16.
    out_bf16 = _run(x, w1, b1, w2, b2)
    assert jnp.allclose(out_bf16, ref, atol=2e-1, rtol=2e-2), \
        f"bf16 max err {jnp.max(jnp.abs(out_bf16 - ref))}"

    print("KERNEL_OK")
</pallas_src>

<mosaic_0001>
module attributes {stable_mosaic.version = 11 : i64} {
  func.func @_resnet_block_kernel(%arg0: i32, %arg1: memref<1x4x256xf32, #tpu.memory_space<vmem>>, %arg2: memref<9x4x4xf32, #tpu.memory_space<vmem>>, %arg3: memref<4x1xf32, #tpu.memory_space<vmem>>, %arg4: memref<9x4x4xf32, #tpu.memory_space<vmem>>, %arg5: memref<4x1xf32, #tpu.memory_space<vmem>>, %arg6: memref<1x4x256xf32, #tpu.memory_space<vmem>>, %arg7: memref<4x512xf32, #tpu.memory_space<vmem>>) attributes {dimension_semantics = [#tpu.dimension_semantics<parallel>], iteration_bounds = array<i64: 2>, scalar_prefetch = 0 : i64, scratch_operands = 1 : i64, tpu.core_type = #tpu.core_type<tc>, window_params = [{transform_indices = @transform_0, window_bounds = array<i64: 1, 4, 256>}, {pipeline_mode = #tpu.pipeline_mode<synchronous>, transform_indices = @transform_1, window_bounds = array<i64: 9, 4, 4>}, {pipeline_mode = #tpu.pipeline_mode<synchronous>, transform_indices = @transform_2, window_bounds = array<i64: 4, 1>}, {pipeline_mode = #tpu.pipeline_mode<synchronous>, transform_indices = @transform_3, window_bounds = array<i64: 9, 4, 4>}, {pipeline_mode = #tpu.pipeline_mode<synchronous>, transform_indices = @transform_4, window_bounds = array<i64: 4, 1>}, {transform_indices = @transform_5, window_bounds = array<i64: 1, 4, 256>}]} {
    %0 = tpu.iota {dimensions = array<i32: 1>} : vector<1x256xi32>
    %c16_i32 = arith.constant 16 : i32
    %c0_i32 = arith.constant 0 : i32
    %1 = arith.cmpi eq, %c16_i32, %c0_i32 : i32
    %c1_i32 = arith.constant 1 : i32
    %2 = arith.select %1, %c1_i32, %c16_i32 : i32
    %3 = vector.broadcast %2 : i32 to vector<1x256xi32>
    %4 = arith.remsi %0, %3 : vector<1x256xi32>
    %c0_i32_0 = arith.constant 0 : i32
    %5 = vector.broadcast %c0_i32_0 : i32 to vector<1x256xi32>
    %6 = arith.cmpi ne, %4, %5 : vector<1x256xi32>
    %c0_i32_1 = arith.constant 0 : i32
    %7 = vector.broadcast %c0_i32_1 : i32 to vector<1x256xi32>
    %8 = arith.cmpi slt, %4, %7 : vector<1x256xi32>
    %c0_i32_2 = arith.constant 0 : i32
    %9 = arith.cmpi slt, %2, %c0_i32_2 : i32
    %10 = vector.broadcast %9 : i1 to vector<1x256xi1>
    %11 = vector.broadcast %10 : vector<1x256xi1> to vector<1x256xi1>
    %12 = arith.xori %8, %11 : vector<1x256xi1>
    %13 = arith.andi %12, %6 : vector<1x256xi1>
    %14 = vector.broadcast %2 : i32 to vector<1x256xi32>
    %15 = arith.addi %4, %14 : vector<1x256xi32>
    %16 = arith.select %13, %15, %4 : vector<1x256xi1>, vector<1x256xi32>
    %c0_i32_3 = arith.constant 0 : i32
    %17 = vector.broadcast %c0_i32_3 : i32 to vector<1x256xi32>
    %18 = arith.cmpi eq, %16, %17 : vector<1x256xi32>
    %c15_i32 = arith.constant 15 : i32
    %19 = vector.broadcast %c15_i32 : i32 to vector<1x256xi32>
    %20 = arith.cmpi eq, %16, %19 : vector<1x256xi32>
    %c0_i32_4 = arith.constant 0 : i32
    %21 = arith.cmpi eq, %arg0, %c0_i32_4 : i32
    %22 = arith.extui %21 : i1 to i32
    %c0_i32_5 = arith.constant 0 : i32
    %23 = arith.cmpi ne, %22, %c0_i32_5 : i32
    scf.if %23 {
      %cst_131 = arith.constant 0.000000e+00 : f32
      %216 = vector.broadcast %cst_131 : f32 to vector<4x112xf32>
      %c0_132 = arith.constant 0 : index
      %c0_133 = arith.constant 0 : index
      %217 = vector.load %arg7[%c0_132, %c0_133] : memref<4x512xf32, #tpu.memory_space<vmem>>, vector<4x112xf32>
      tpu.vector_store %arg7[%c0_132, %c0_133], %216 {strides = array<i32>} : memref<4x512xf32, #tpu.memory_space<vmem>>, vector<4x112xf32>,
      %cst_134 = arith.constant 0.000000e+00 : f32
      %218 = vector.broadcast %cst_134 : f32 to vector<4x112xf32>
      %c0_135 = arith.constant 0 : index
      %c400 = arith.constant 400 : index
      %219 = vector.load %arg7[%c0_135, %c400] : memref<4x512xf32, #tpu.memory_space<vmem>>, vector<4x112xf32>
      tpu.vector_store %arg7[%c0_135, %c400], %218 {strides = array<i32>} : memref<4x512xf32, #tpu.memory_space<vmem>>, vector<4x112xf32>,
    } else {
    }
    %c0 = arith.constant 0 : index
    %c0_6 = arith.constant 0 : index
    %c0_7 = arith.constant 0 : index
    %24 = vector.load %arg1[%c0, %c0_6, %c0_7] : memref<1x4x256xf32, #tpu.memory_space<vmem>>, vector<1x4x256xf32>
    %25 = vector.shape_cast %24 : vector<1x4x256xf32> to vector<4x256xf32>
    %26 = vector.extract_strided_slice %25 {offsets = [0, 16], sizes = [4, 16], strides = [1, 1]} : vector<4x256xf32> to vector<4x16xf32>
    %c0_8 = arith.constant 0 : index
    %c112 = arith.constant 112 : index
    %27 = vector.load %arg7[%c0_8, %c112] : memref<4x512xf32, #tpu.memory_space<vmem>>, vector<4x16xf32>
    tpu.vector_store %arg7[%c0_8, %c112], %26 {strides = array<i32>} : memref<4x512xf32, #tpu.memory_space<vmem>>, vector<4x16xf32>,
    %c0_9 = arith.constant 0 : index
    %c128 = arith.constant 128 : index
    %28 = vector.load %arg7[%c0_9, %c128] : memref<4x512xf32, #tpu.memory_space<vmem>>, vector<4x256xf32>
    tpu.vector_store %arg7[%c0_9, %c128], %25 {strides = array<i32>} : memref<4x512xf32, #tpu.memory_space<vmem>>, vector<4x256xf32>,
    %29 = vector.extract_strided_slice %25 {offsets = [0, 224], sizes = [4, 16], strides = [1, 1]} : vector<4x256xf32> to vector<4x16xf32>
    %c0_10 = arith.constant 0 : index
    %c384 = arith.constant 384 : index
    %30 = vector.load %arg7[%c0_10, %c384] : memref<4x512xf32, #tpu.memory_space<vmem>>, vector<4x16xf32>
    tpu.vector_store %arg7[%c0_10, %c384], %29 {strides = array<i32>} : memref<4x512xf32, #tpu.memory_space<vmem>>, vector<4x16xf32>,
    %c0_11 = arith.constant 0 : index
    %c111 = arith.constant 111 : index
    %31 = vector.load %arg7[%c0_11, %c111] : memref<4x512xf32, #tpu.memory_space<vmem>>, vector<4x256xf32>
    %c0_12 = arith.constant 0 : index
    %c112_13 = arith.constant 112 : index
    %32 = vector.load %arg7[%c0_12, %c112_13] : memref<4x512xf32, #tpu.memory_space<vmem>>, vector<4x256xf32>
    %c0_14 = arith.constant 0 : index
    %c113 = arith.constant 113 : index
    %33 = vector.load %arg7[%c0_14, %c113] : memref<4x512xf32, #tpu.memory_space<vmem>>, vector<4x256xf32>
    %34 = vector.shape_cast %18 : vector<1x256xi1> to vector<1x256xi1>
    %35 = vector.broadcast %34 : vector<1x256xi1> to vector<4x256xi1>
    %36 = arith.select %35, %33, %31 : vector<4x256xi1>, vector<4x256xf32>
    %37 = vector.shape_cast %20 : vector<1x256xi1> to vector<1x256xi1>
    %38 = vector.broadcast %37 : vector<1x256xi1> to vector<4x256xi1>
    %39 = arith.select %38, %31, %33 : vector<4x256xi1>, vector<4x256xf32>
    %c0_15 = arith.constant 0 : index
    %c127 = arith.constant 127 : index
    %40 = vector.load %arg7[%c0_15, %c127] : memref<4x512xf32, #tpu.memory_space<vmem>>, vector<4x256xf32>
    %c0_16 = arith.constant 0 : index
    %c128_17 = arith.constant 128 : index
    %41 = vector.load %arg7[%c0_16, %c128_17] : memref<4x512xf32, #tpu.memory_space<vmem>>, vector<4x256xf32>
    %c0_18 = arith.constant 0 : index
    %c129 = arith.constant 129 : index
    %42 = vector.load %arg7[%c0_18, %c129] : memref<4x512xf32, #tpu.memory_space<vmem>>, vector<4x256xf32>
    %43 = vector.shape_cast %18 : vector<1x256xi1> to vector<1x256xi1>
    %44 = vector.broadcast %43 : vector<1x256xi1> to vector<4x256xi1>
    %45 = arith.select %44, %42, %40 : vector<4x256xi1>, vector<4x256xf32>
    %46 = vector.shape_cast %20 : vector<1x256xi1> to vector<1x256xi1>
    %47 = vector.broadcast %46 : vector<1x256xi1> to vector<4x256xi1>
    %48 = arith.select %47, %40, %42 : vector<4x256xi1>, vector<4x256xf32>
    %c0_19 = arith.constant 0 : index
    %c143 = arith.constant 143 : index
    %49 = vector.load %arg7[%c0_19, %c143] : memref<4x512xf32, #tpu.memory_space<vmem>>, vector<4x256xf32>
    %c0_20 = arith.constant 0 : index
    %c144 = arith.constant 144 : index
    %50 = vector.load %arg7[%c0_20, %c144] : memref<4x512xf32, #tpu.memory_space<vmem>>, vector<4x256xf32>
    %c0_21 = arith.constant 0 : index
    %c145 = arith.constant 145 : index
    %51 = vector.load %arg7[%c0_21, %c145] : memref<4x512xf32, #tpu.memory_space<vmem>>, vector<4x256xf32>
    %52 = vector.shape_cast %18 : vector<1x256xi1> to vector<1x256xi1>
    %53 = vector.broadcast %52 : vector<1x256xi1> to vector<4x256xi1>
    %54 = arith.select %53, %51, %49 : vector<4x256xi1>, vector<4x256xf32>
    %55 = vector.shape_cast %20 : vector<1x256xi1> to vector<1x256xi1>
    %56 = vector.broadcast %55 : vector<1x256xi1> to vector<4x256xi1>
    %57 = arith.select %56, %49, %51 : vector<4x256xi1>, vector<4x256xf32>
    %cst = arith.constant 0.000000e+00 : f32
    %58 = vector.broadcast %cst : f32 to vector<4x256xf32>
    %c0_22 = arith.constant 0 : index
    %c0_23 = arith.constant 0 : index
    %c0_24 = arith.constant 0 : index
    %59 = vector.load %arg2[%c0_22, %c0_23, %c0_24] : memref<9x4x4xf32, #tpu.memory_space<vmem>>, vector<1x4x4xf32>
    %60 = vector.shape_cast %59 : vector<1x4x4xf32> to vector<4x4xf32>
    %cst_25 = arith.constant dense<0.000000e+00> : vector<4x256xf32>
    %61 = tpu.matmul %60, %36, %cst_25 {dimension_numbers = #tpu.dot_dimension_numbers<[1], [0], [0], [1], [0, 0, 1, 1], [], []>} : vector<4x4xf32>, vector<4x256xf32>, vector<4x256xf32> -> vector<4x256xf32>
    %62 = arith.addf %58, %61 : vector<4x256xf32>
    %c1 = arith.constant 1 : index
    %c0_26 = arith.constant 0 : index
    %c0_27 = arith.constant 0 : index
    %63 = vector.load %arg2[%c1, %c0_26, %c0_27] : memref<9x4x4xf32, #tpu.memory_space<vmem>>, vector<1x4x4xf32>
    %64 = vector.shape_cast %63 : vector<1x4x4xf32> to vector<4x4xf32>
    %cst_28 = arith.constant dense<0.000000e+00> : vector<4x256xf32>
    %65 = tpu.matmul %64, %32, %cst_28 {dimension_numbers = #tpu.dot_dimension_numbers<[1], [0], [0], [1], [0, 0, 1, 1], [], []>} : vector<4x4xf32>, vector<4x256xf32>, vector<4x256xf32> -> vector<4x256xf32>
    %66 = arith.addf %62, %65 : vector<4x256xf32>
    %c2 = arith.constant 2 : index
    %c0_29 = arith.constant 0 : index
    %c0_30 = arith.constant 0 : index
    %67 = vector.load %arg2[%c2, %c0_29, %c0_30] : memref<9x4x4xf32, #tpu.memory_space<vmem>>, vector<1x4x4xf32>
    %68 = vector.shape_cast %67 : vector<1x4x4xf32> to vector<4x4xf32>
    %cst_31 = arith.constant dense<0.000000e+00> : vector<4x256xf32>
    %69 = tpu.matmul %68, %39, %cst_31 {dimension_numbers = #tpu.dot_dimension_numbers<[1], [0], [0], [1], [0, 0, 1, 1], [], []>} : vector<4x4xf32>, vector<4x256xf32>, vector<4x256xf32> -> vector<4x256xf32>
    %70 = arith.addf %66, %69 : vector<4x256xf32>
    %c3 = arith.constant 3 : index
    %c0_32 = arith.constant 0 : index
    %c0_33 = arith.constant 0 : index
    %71 = vector.load %arg2[%c3, %c0_32, %c0_33] : memref<9x4x4xf32, #tpu.memory_space<vmem>>, vector<1x4x4xf32>
    %72 = vector.shape_cast %71 : vector<1x4x4xf32> to vector<4x4xf32>
    %cst_34 = arith.constant dense<0.000000e+00> : vector<4x256xf32>
    %73 = tpu.matmul %72, %45, %cst_34 {dimension_numbers = #tpu.dot_dimension_numbers<[1], [0], [0], [1], [0, 0, 1, 1], [], []>} : vector<4x4xf32>, vector<4x256xf32>, vector<4x256xf32> -> vector<4x256xf32>
    %74 = arith.addf %70, %73 : vector<4x256xf32>
    %c4 = arith.constant 4 : index
    %c0_35 = arith.constant 0 : index
    %c0_36 = arith.constant 0 : index
    %75 = vector.load %arg2[%c4, %c0_35, %c0_36] : memref<9x4x4xf32, #tpu.memory_space<vmem>>, vector<1x4x4xf32>
    %76 = vector.shape_cast %75 : vector<1x4x4xf32> to vector<4x4xf32>
    %cst_37 = arith.constant dense<0.000000e+00> : vector<4x256xf32>
    %77 = tpu.matmul %76, %41, %cst_37 {dimension_numbers = #tpu.dot_dimension_numbers<[1], [0], [0], [1], [0, 0, 1, 1], [], []>} : vector<4x4xf32>, vector<4x256xf32>, vector<4x256xf32> -> vector<4x256xf32>
    %78 = arith.addf %74, %77 : vector<4x256xf32>
    %c5 = arith.constant 5 : index
    %c0_38 = arith.constant 0 : index
    %c0_39 = arith.constant 0 : index
    %79 = vector.load %arg2[%c5, %c0_38, %c0_39] : memref<9x4x4xf32, #tpu.memory_space<vmem>>, vector<1x4x4xf32>
    %80 = vector.shape_cast %79 : vector<1x4x4xf32> to vector<4x4xf32>
    %cst_40 = arith.constant dense<0.000000e+00> : vector<4x256xf32>
    %81 = tpu.matmul %80, %48, %cst_40 {dimension_numbers = #tpu.dot_dimension_numbers<[1], [0], [0], [1], [0, 0, 1, 1], [], []>} : vector<4x4xf32>, vector<4x256xf32>, vector<4x256xf32> -> vector<4x256xf32>
    %82 = arith.addf %78, %81 : vector<4x256xf32>
    %c6 = arith.constant 6 : index
    %c0_41 = arith.constant 0 : index
    %c0_42 = arith.constant 0 : index
    %83 = vector.load %arg2[%c6, %c0_41, %c0_42] : memref<9x4x4xf32, #tpu.memory_space<vmem>>, vector<1x4x4xf32>
    %84 = vector.shape_cast %83 : vector<1x4x4xf32> to vector<4x4xf32>
    %cst_43 = arith.constant dense<0.000000e+00> : vector<4x256xf32>
    %85 = tpu.matmul %84, %54, %cst_43 {dimension_numbers = #tpu.dot_dimension_numbers<[1], [0], [0], [1], [0, 0, 1, 1], [], []>} : vector<4x4xf32>, vector<4x256xf32>, vector<4x256xf32> -> vector<4x256xf32>
    %86 = arith.addf %82, %85 : vector<4x256xf32>
    %c7 = arith.constant 7 : index
    %c0_44 = arith.constant 0 : index
    %c0_45 = arith.constant 0 : index
    %87 = vector.load %arg2[%c7, %c0_44, %c0_45] : memref<9x4x4xf32, #tpu.memory_space<vmem>>, vector<1x4x4xf32>
    %88 = vector.shape_cast %87 : vector<1x4x4xf32> to vector<4x4xf32>
    %cst_46 = arith.constant dense<0.000000e+00> : vector<4x256xf32>
    %89 = tpu.matmul %88, %50, %cst_46 {dimension_numbers = #tpu.dot_dimension_numbers<[1], [0], [0], [1], [0, 0, 1, 1], [], []>} : vector<4x4xf32>, vector<4x256xf32>, vector<4x256xf32> -> vector<4x256xf32>
    %90 = arith.addf %86, %89 : vector<4x256xf32>
    %c8 = arith.constant 8 : index
    %c0_47 = arith.constant 0 : index
    %c0_48 = arith.constant 0 : index
    %91 = vector.load %arg2[%c8, %c0_47, %c0_48] : memref<9x4x4xf32, #tpu.memory_space<vmem>>, vector<1x4x4xf32>
    %92 = vector.shape_cast %91 : vector<1x4x4xf32> to vector<4x4xf32>
    %cst_49 = arith.constant dense<0.000000e+00> : vector<4x256xf32>
    %93 = tpu.matmul %92, %57, %cst_49 {dimension_numbers = #tpu.dot_dimension_numbers<[1], [0], [0], [1], [0, 0, 1, 1], [], []>} : vector<4x4xf32>, vector<4x256xf32>, vector<4x256xf32> -> vector<4x256xf32>
    %94 = arith.addf %90, %93 : vector<4x256xf32>
    %c0_50 = arith.constant 0 : index
    %c0_51 = arith.constant 0 : index
    %95 = vector.load %arg3[%c0_50, %c0_51] : memref<4x1xf32, #tpu.memory_space<vmem>>, vector<4x1xf32>
    %96 = vector.broadcast %95 : vector<4x1xf32> to vector<4x256xf32>
    %97 = arith.addf %94, %96 : vector<4x256xf32>
    %cst_52 = arith.constant dense<0.000000e+00> : vector<4xf32>
    %98 = vector.multi_reduction <add>, %97, %cst_52 [1] : vector<4x256xf32> to vector<4xf32>
    %99 = vector.shape_cast %98 : vector<4xf32> to vector<4x1xf32>
    %cst_53 = arith.constant 3.906250e-03 : f32
    %100 = vector.broadcast %cst_53 : f32 to vector<4x1xf32>
    %101 = arith.mulf %99, %100 : vector<4x1xf32>
    %102 = arith.mulf %97, %97 : vector<4x256xf32>
    %cst_54 = arith.constant dense<0.000000e+00> : vector<4xf32>
    %103 = vector.multi_reduction <add>, %102, %cst_54 [1] : vector<4x256xf32> to vector<4xf32>
    %104 = vector.shape_cast %103 : vector<4xf32> to vector<4x1xf32>
    %cst_55 = arith.constant 3.906250e-03 : f32
    %105 = vector.broadcast %cst_55 : f32 to vector<4x1xf32>
    %106 = arith.mulf %104, %105 : vector<4x1xf32>
    %107 = arith.mulf %101, %101 : vector<4x1xf32>
    %108 = arith.subf %106, %107 : vector<4x1xf32>
    %cst_56 = arith.constant 0.000000e+00 : f32
    %109 = vector.broadcast %cst_56 : f32 to vector<4x1xf32>
    %110 = arith.maximumf %108, %109 : vector<4x1xf32>
    %111 = vector.broadcast %101 : vector<4x1xf32> to vector<4x256xf32>
    %112 = arith.subf %97, %111 : vector<4x256xf32>
    %cst_57 = arith.constant 9.99999974E-6 : f32
    %113 = vector.broadcast %cst_57 : f32 to vector<4x1xf32>
    %114 = arith.addf %110, %113 : vector<4x1xf32>
    %115 = math.rsqrt %114 : vector<4x1xf32>
    %116 = vector.broadcast %115 : vector<4x1xf32> to vector<4x256xf32>
    %117 = arith.mulf %112, %116 : vector<4x256xf32>
    %cst_58 = arith.constant 0.000000e+00 : f32
    %118 = vector.broadcast %cst_58 : f32 to vector<4x256xf32>
    %119 = arith.maximumf %117, %118 : vector<4x256xf32>
    %120 = vector.extract_strided_slice %119 {offsets = [0, 16], sizes = [4, 16], strides = [1, 1]} : vector<4x256xf32> to vector<4x16xf32>
    %c0_59 = arith.constant 0 : index
    %c112_60 = arith.constant 112 : index
    %121 = vector.load %arg7[%c0_59, %c112_60] : memref<4x512xf32, #tpu.memory_space<vmem>>, vector<4x16xf32>
    tpu.vector_store %arg7[%c0_59, %c112_60], %120 {strides = array<i32>} : memref<4x512xf32, #tpu.memory_space<vmem>>, vector<4x16xf32>,
    %c0_61 = arith.constant 0 : index
    %c128_62 = arith.constant 128 : index
    %122 = vector.load %arg7[%c0_61, %c128_62] : memref<4x512xf32, #tpu.memory_space<vmem>>, vector<4x256xf32>
    tpu.vector_store %arg7[%c0_61, %c128_62], %119 {strides = array<i32>} : memref<4x512xf32, #tpu.memory_space<vmem>>, vector<4x256xf32>,
    %123 = vector.extract_strided_slice %119 {offsets = [0, 224], sizes = [4, 16], strides = [1, 1]} : vector<4x256xf32> to vector<4x16xf32>
    %c0_63 = arith.constant 0 : index
    %c384_64 = arith.constant 384 : index
    %124 = vector.load %arg7[%c0_63, %c384_64] : memref<4x512xf32, #tpu.memory_space<vmem>>, vector<4x16xf32>
    tpu.vector_store %arg7[%c0_63, %c384_64], %123 {strides = array<i32>} : memref<4x512xf32, #tpu.memory_space<vmem>>, vector<4x16xf32>,
    %c0_65 = arith.constant 0 : index
    %c111_66 = arith.constant 111 : index
    %125 = vector.load %arg7[%c0_65, %c111_66] : memref<4x512xf32, #tpu.memory_space<vmem>>, vector<4x256xf32>
    %c0_67 = arith.constant 0 : index
    %c112_68 = arith.constant 112 : index
    %126 = vector.load %arg7[%c0_67, %c112_68] : memref<4x512xf32, #tpu.memory_space<vmem>>, vector<4x256xf32>
    %c0_69 = arith.constant 0 : index
    %c113_70 = arith.constant 113 : index
    %127 = vector.load %arg7[%c0_69, %c113_70] : memref<4x512xf32, #tpu.memory_space<vmem>>, vector<4x256xf32>
    %128 = vector.shape_cast %18 : vector<1x256xi1> to vector<1x256xi1>
    %129 = vector.broadcast %128 : vector<1x256xi1> to vector<4x256xi1>
    %130 = arith.select %129, %127, %125 : vector<4x256xi1>, vector<4x256xf32>
    %131 = vector.shape_cast %20 : vector<1x256xi1> to vector<1x256xi1>
    %132 = vector.broadcast %131 : vector<1x256xi1> to vector<4x256xi1>
    %133 = arith.select %132, %125, %127 : vector<4x256xi1>, vector<4x256xf32>
    %c0_71 = arith.constant 0 : index
    %c127_72 = arith.constant 127 : index
    %134 = vector.load %arg7[%c0_71, %c127_72] : memref<4x512xf32, #tpu.memory_space<vmem>>, vector<4x256xf32>
    %c0_73 = arith.constant 0 : index
    %c128_74 = arith.constant 128 : index
    %135 = vector.load %arg7[%c0_73, %c128_74] : memref<4x512xf32, #tpu.memory_space<vmem>>, vector<4x256xf32>
    %c0_75 = arith.constant 0 : index
    %c129_76 = arith.constant 129 : index
    %136 = vector.load %arg7[%c0_75, %c129_76] : memref<4x512xf32, #tpu.memory_space<vmem>>, vector<4x256xf32>
    %137 = vector.shape_cast %18 : vector<1x256xi1> to vector<1x256xi1>
    %138 = vector.broadcast %137 : vector<1x256xi1> to vector<4x256xi1>
    %139 = arith.select %138, %136, %134 : vector<4x256xi1>, vector<4x256xf32>
    %140 = vector.shape_cast %20 : vector<1x256xi1> to vector<1x256xi1>
    %141 = vector.broadcast %140 : vector<1x256xi1> to vector<4x256xi1>
    %142 = arith.select %141, %134, %136 : vector<4x256xi1>, vector<4x256xf32>
    %c0_77 = arith.constant 0 : index
    %c143_78 = arith.constant 143 : index
    %143 = vector.load %arg7[%c0_77, %c143_78] : memref<4x512xf32, #tpu.memory_space<vmem>>, vector<4x256xf32>
    %c0_79 = arith.constant 0 : index
    %c144_80 = arith.constant 144 : index
    %144 = vector.load %arg7[%c0_79, %c144_80] : memref<4x512xf32, #tpu.memory_space<vmem>>, vector<4x256xf32>
    %c0_81 = arith.constant 0 : index
    %c145_82 = arith.constant 145 : index
    %145 = vector.load %arg7[%c0_81, %c145_82] : memref<4x512xf32, #tpu.memory_space<vmem>>, vector<4x256xf32>
    %146 = vector.shape_cast %18 : vector<1x256xi1> to vector<1x256xi1>
    %147 = vector.broadcast %146 : vector<1x256xi1> to vector<4x256xi1>
    %148 = arith.select %147, %145, %143 : vector<4x256xi1>, vector<4x256xf32>
    %149 = vector.shape_cast %20 : vector<1x256xi1> to vector<1x256xi1>
    %150 = vector.broadcast %149 : vector<1x256xi1> to vector<4x256xi1>
    %151 = arith.select %150, %143, %145 : vector<4x256xi1>, vector<4x256xf32>
    %cst_83 = arith.constant 0.000000e+00 : f32
    %152 = vector.broadcast %cst_83 : f32 to vector<4x256xf32>
    %c0_84 = arith.constant 0 : index
    %c0_85 = arith.constant 0 : index
    %c0_86 = arith.constant 0 : index
    %153 = vector.load %arg4[%c0_84, %c0_85, %c0_86] : memref<9x4x4xf32, #tpu.memory_space<vmem>>, vector<1x4x4xf32>
    %154 = vector.shape_cast %153 : vector<1x4x4xf32> to vector<4x4xf32>
    %cst_87 = arith.constant dense<0.000000e+00> : vector<4x256xf32>
    %155 = tpu.matmul %154, %130, %cst_87 {dimension_numbers = #tpu.dot_dimension_numbers<[1], [0], [0], [1], [0, 0, 1, 1], [], []>} : vector<4x4xf32>, vector<4x256xf32>, vector<4x256xf32> -> vector<4x256xf32>
    %156 = arith.addf %152, %155 : vector<4x256xf32>
    %c1_88 = arith.constant 1 : index
    %c0_89 = arith.constant 0 : index
    %c0_90 = arith.constant 0 : index
    %157 = vector.load %arg4[%c1_88, %c0_89, %c0_90] : memref<9x4x4xf32, #tpu.memory_space<vmem>>, vector<1x4x4xf32>
    %158 = vector.shape_cast %157 : vector<1x4x4xf32> to vector<4x4xf32>
    %cst_91 = arith.constant dense<0.000000e+00> : vector<4x256xf32>
    %159 = tpu.matmul %158, %126, %cst_91 {dimension_numbers = #tpu.dot_dimension_numbers<[1], [0], [0], [1], [0, 0, 1, 1], [], []>} : vector<4x4xf32>, vector<4x256xf32>, vector<4x256xf32> -> vector<4x256xf32>
    %160 = arith.addf %156, %159 : vector<4x256xf32>
    %c2_92 = arith.constant 2 : index
    %c0_93 = arith.constant 0 : index
    %c0_94 = arith.constant 0 : index
    %161 = vector.load %arg4[%c2_92, %c0_93, %c0_94] : memref<9x4x4xf32, #tpu.memory_space<vmem>>, vector<1x4x4xf32>
    %162 = vector.shape_cast %161 : vector<1x4x4xf32> to vector<4x4xf32>
    %cst_95 = arith.constant dense<0.000000e+00> : vector<4x256xf32>
    %163 = tpu.matmul %162, %133, %cst_95 {dimension_numbers = #tpu.dot_dimension_numbers<[1], [0], [0], [1], [0, 0, 1, 1], [], []>} : vector<4x4xf32>, vector<4x256xf32>, vector<4x256xf32> -> vector<4x256xf32>
    %164 = arith.addf %160, %163 : vector<4x256xf32>
    %c3_96 = arith.constant 3 : index
    %c0_97 = arith.constant 0 : index
    %c0_98 = arith.constant 0 : index
    %165 = vector.load %arg4[%c3_96, %c0_97, %c0_98] : memref<9x4x4xf32, #tpu.memory_space<vmem>>, vector<1x4x4xf32>
    %166 = vector.shape_cast %165 : vector<1x4x4xf32> to vector<4x4xf32>
    %cst_99 = arith.constant dense<0.000000e+00> : vector<4x256xf32>
    %167 = tpu.matmul %166, %139, %cst_99 {dimension_numbers = #tpu.dot_dimension_numbers<[1], [0], [0], [1], [0, 0, 1, 1], [], []>} : vector<4x4xf32>, vector<4x256xf32>, vector<4x256xf32> -> vector<4x256xf32>
    %168 = arith.addf %164, %167 : vector<4x256xf32>
    %c4_100 = arith.constant 4 : index
    %c0_101 = arith.constant 0 : index
    %c0_102 = arith.constant 0 : index
    %169 = vector.load %arg4[%c4_100, %c0_101, %c0_102] : memref<9x4x4xf32, #tpu.memory_space<vmem>>, vector<1x4x4xf32>
    %170 = vector.shape_cast %169 : vector<1x4x4xf32> to vector<4x4xf32>
    %cst_103 = arith.constant dense<0.000000e+00> : vector<4x256xf32>
    %171 = tpu.matmul %170, %135, %cst_103 {dimension_numbers = #tpu.dot_dimension_numbers<[1], [0], [0], [1], [0, 0, 1, 1], [], []>} : vector<4x4xf32>, vector<4x256xf32>, vector<4x256xf32> -> vector<4x256xf32>
    %172 = arith.addf %168, %171 : vector<4x256xf32>
    %c5_104 = arith.constant 5 : index
    %c0_105 = arith.constant 0 : index
    %c0_106 = arith.constant 0 : index
    %173 = vector.load %arg4[%c5_104, %c0_105, %c0_106] : memref<9x4x4xf32, #tpu.memory_space<vmem>>, vector<1x4x4xf32>
    %174 = vector.shape_cast %173 : vector<1x4x4xf32> to vector<4x4xf32>
    %cst_107 = arith.constant dense<0.000000e+00> : vector<4x256xf32>
    %175 = tpu.matmul %174, %142, %cst_107 {dimension_numbers = #tpu.dot_dimension_numbers<[1], [0], [0], [1], [0, 0, 1, 1], [], []>} : vector<4x4xf32>, vector<4x256xf32>, vector<4x256xf32> -> vector<4x256xf32>
    %176 = arith.addf %172, %175 : vector<4x256xf32>
    %c6_108 = arith.constant 6 : index
    %c0_109 = arith.constant 0 : index
    %c0_110 = arith.constant 0 : index
    %177 = vector.load %arg4[%c6_108, %c0_109, %c0_110] : memref<9x4x4xf32, #tpu.memory_space<vmem>>, vector<1x4x4xf32>
    %178 = vector.shape_cast %177 : vector<1x4x4xf32> to vector<4x4xf32>
    %cst_111 = arith.constant dense<0.000000e+00> : vector<4x256xf32>
    %179 = tpu.matmul %178, %148, %cst_111 {dimension_numbers = #tpu.dot_dimension_numbers<[1], [0], [0], [1], [0, 0, 1, 1], [], []>} : vector<4x4xf32>, vector<4x256xf32>, vector<4x256xf32> -> vector<4x256xf32>
    %180 = arith.addf %176, %179 : vector<4x256xf32>
    %c7_112 = arith.constant 7 : index
    %c0_113 = arith.constant 0 : index
    %c0_114 = arith.constant 0 : index
    %181 = vector.load %arg4[%c7_112, %c0_113, %c0_114] : memref<9x4x4xf32, #tpu.memory_space<vmem>>, vector<1x4x4xf32>
    %182 = vector.shape_cast %181 : vector<1x4x4xf32> to vector<4x4xf32>
    %cst_115 = arith.constant dense<0.000000e+00> : vector<4x256xf32>
    %183 = tpu.matmul %182, %144, %cst_115 {dimension_numbers = #tpu.dot_dimension_numbers<[1], [0], [0], [1], [0, 0, 1, 1], [], []>} : vector<4x4xf32>, vector<4x256xf32>, vector<4x256xf32> -> vector<4x256xf32>
    %184 = arith.addf %180, %183 : vector<4x256xf32>
    %c8_116 = arith.constant 8 : index
    %c0_117 = arith.constant 0 : index
    %c0_118 = arith.constant 0 : index
    %185 = vector.load %arg4[%c8_116, %c0_117, %c0_118] : memref<9x4x4xf32, #tpu.memory_space<vmem>>, vector<1x4x4xf32>
    %186 = vector.shape_cast %185 : vector<1x4x4xf32> to vector<4x4xf32>
    %cst_119 = arith.constant dense<0.000000e+00> : vector<4x256xf32>
    %187 = tpu.matmul %186, %151, %cst_119 {dimension_numbers = #tpu.dot_dimension_numbers<[1], [0], [0], [1], [0, 0, 1, 1], [], []>} : vector<4x4xf32>, vector<4x256xf32>, vector<4x256xf32> -> vector<4x256xf32>
    %188 = arith.addf %184, %187 : vector<4x256xf32>
    %c0_120 = arith.constant 0 : index
    %c0_121 = arith.constant 0 : index
    %189 = vector.load %arg5[%c0_120, %c0_121] : memref<4x1xf32, #tpu.memory_space<vmem>>, vector<4x1xf32>
    %190 = vector.broadcast %189 : vector<4x1xf32> to vector<4x256xf32>
    %191 = arith.addf %188, %190 : vector<4x256xf32>
    %cst_122 = arith.constant dense<0.000000e+00> : vector<4xf32>
    %192 = vector.multi_reduction <add>, %191, %cst_122 [1] : vector<4x256xf32> to vector<4xf32>
    %193 = vector.shape_cast %192 : vector<4xf32> to vector<4x1xf32>
    %cst_123 = arith.constant 3.906250e-03 : f32
    %194 = vector.broadcast %cst_123 : f32 to vector<4x1xf32>
    %195 = arith.mulf %193, %194 : vector<4x1xf32>
    %196 = arith.mulf %191, %191 : vector<4x256xf32>
    %cst_124 = arith.constant dense<0.000000e+00> : vector<4xf32>
    %197 = vector.multi_reduction <add>, %196, %cst_124 [1] : vector<4x256xf32> to vector<4xf32>
    %198 = vector.shape_cast %197 : vector<4xf32> to vector<4x1xf32>
    %cst_125 = arith.constant 3.906250e-03 : f32
    %199 = vector.broadcast %cst_125 : f32 to vector<4x1xf32>
    %200 = arith.mulf %198, %199 : vector<4x1xf32>
    %201 = arith.mulf %195, %195 : vector<4x1xf32>
    %202 = arith.subf %200, %201 : vector<4x1xf32>
    %cst_126 = arith.constant 0.000000e+00 : f32
    %203 = vector.broadcast %cst_126 : f32 to vector<4x1xf32>
    %204 = arith.maximumf %202, %203 : vector<4x1xf32>
    %205 = vector.broadcast %195 : vector<4x1xf32> to vector<4x256xf32>
    %206 = arith.subf %191, %205 : vector<4x256xf32>
    %cst_127 = arith.constant 9.99999974E-6 : f32
    %207 = vector.broadcast %cst_127 : f32 to vector<4x1xf32>
    %208 = arith.addf %204, %207 : vector<4x1xf32>
    %209 = math.rsqrt %208 : vector<4x1xf32>
    %210 = vector.broadcast %209 : vector<4x1xf32> to vector<4x256xf32>
    %211 = arith.mulf %206, %210 : vector<4x256xf32>
    %212 = arith.addf %25, %211 : vector<4x256xf32>
    %c0_128 = arith.constant 0 : index
    %c0_129 = arith.constant 0 : index
    %c0_130 = arith.constant 0 : index
    %213 = vector.load %arg6[%c0_128, %c0_129, %c0_130] : memref<1x4x256xf32, #tpu.memory_space<vmem>>, vector<1x4x256xf32>
    %214 = vector.shape_cast %213 : vector<1x4x256xf32> to vector<4x256xf32>
    %215 = vector.shape_cast %212 : vector<4x256xf32> to vector<1x4x256xf32>
    tpu.vector_store %arg6[%c0_128, %c0_129, %c0_130], %215 {strides = array<i32>} : memref<1x4x256xf32, #tpu.memory_space<vmem>>, vector<1x4x256xf32>,
    return
  }
  func.func @transform_0(%arg0: i32) -> (i32, i32, i32) {
    %c0_i32 = arith.constant 0 : i32
    %c0_i32_0 = arith.constant 0 : i32
    %c0_i32_1 = arith.constant 0 : i32
    return %arg0, %c0_i32, %c0_i32_0 : i32, i32, i32
  }
  func.func @transform_1(%arg0: i32) -> (i32, i32, i32) {
    %c0_i32 = arith.constant 0 : i32
    %c0_i32_0 = arith.constant 0 : i32
    %c0_i32_1 = arith.constant 0 : i32
    %c0_i32_2 = arith.constant 0 : i32
    return %c0_i32, %c0_i32_0, %c0_i32_1 : i32, i32, i32
  }
  func.func @transform_2(%arg0: i32) -> (i32, i32) {
    %c0_i32 = arith.constant 0 : i32
    %c0_i32_0 = arith.constant 0 : i32
    %c0_i32_1 = arith.constant 0 : i32
    return %c0_i32, %c0_i32_0 : i32, i32
  }
  func.func @transform_3(%arg0: i32) -> (i32, i32, i32) {
    %c0_i32 = arith.constant 0 : i32
    %c0_i32_0 = arith.constant 0 : i32
    %c0_i32_1 = arith.constant 0 : i32
    %c0_i32_2 = arith.constant 0 : i32
    return %c0_i32, %c0_i32_0, %c0_i32_1 : i32, i32, i32
  }
  func.func @transform_4(%arg0: i32) -> (i32, i32) {
    %c0_i32 = arith.constant 0 : i32
    %c0_i32_0 = arith.constant 0 : i32
    %c0_i32_1 = arith.constant 0 : i32
    return %c0_i32, %c0_i32_0 : i32, i32
  }
  func.func @transform_5(%arg0: i32) -> (i32, i32, i32) {
    %c0_i32 = arith.constant 0 : i32
    %c0_i32_0 = arith.constant 0 : i32
    %c0_i32_1 = arith.constant 0 : i32
    return %arg0, %c0_i32, %c0_i32_0 : i32, i32, i32
  }
}

module attributes {stable_mosaic.version = 11 : i64} {
  func.func @_resnet_block_kernel(%arg0: i32, %arg1: memref<1x4x256xf32, #tpu.memory_space<vmem>>, %arg2: memref<9x4x4xf32, #tpu.memory_space<vmem>>, %arg3: memref<4x1xf32, #tpu.memory_space<vmem>>, %arg4: memref<9x4x4xf32, #tpu.memory_space<vmem>>, %arg5: memref<4x1xf32, #tpu.memory_space<vmem>>, %arg6: memref<1x4x256xf32, #tpu.memory_space<vmem>>, %arg7: memref<4x512xf32, #tpu.memory_space<vmem>>) attributes {dimension_semantics = [#tpu.dimension_semantics<parallel>], iteration_bounds = array<i64: 2>, scalar_prefetch = 0 : i64, scratch_operands = 1 : i64, tpu.core_type = #tpu.core_type<tc>, window_params = [{transform_indices = @transform_0, window_bounds = array<i64: 1, 4, 256>}, {pipeline_mode = #tpu.pipeline_mode<synchronous>, transform_indices = @transform_1, window_bounds = array<i64: 9, 4, 4>}, {pipeline_mode = #tpu.pipeline_mode<synchronous>, transform_indices = @transform_2, window_bounds = array<i64: 4, 1>}, {pipeline_mode = #tpu.pipeline_mode<synchronous>, transform_indices = @transform_3, window_bounds = array<i64: 9, 4, 4>}, {pipeline_mode = #tpu.pipeline_mode<synchronous>, transform_indices = @transform_4, window_bounds = array<i64: 4, 1>}, {transform_indices = @transform_5, window_bounds = array<i64: 1, 4, 256>}]} {
    %0 = tpu.iota {dimensions = array<i32: 1>} : vector<1x256xi32>
    %c16_i32 = arith.constant 16 : i32
    %c0_i32 = arith.constant 0 : i32
    %1 = arith.cmpi eq, %c16_i32, %c0_i32 : i32
    %c1_i32 = arith.constant 1 : i32
    %2 = arith.select %1, %c1_i32, %c16_i32 : i32
    %3 = vector.broadcast %2 : i32 to vector<1x256xi32>
    %4 = arith.remsi %0, %3 : vector<1x256xi32>
    %c0_i32_0 = arith.constant 0 : i32
    %5 = vector.broadcast %c0_i32_0 : i32 to vector<1x256xi32>
    %6 = arith.cmpi ne, %4, %5 : vector<1x256xi32>
    %c0_i32_1 = arith.constant 0 : i32
    %7 = vector.broadcast %c0_i32_1 : i32 to vector<1x256xi32>
    %8 = arith.cmpi slt, %4, %7 : vector<1x256xi32>
    %c0_i32_2 = arith.constant 0 : i32
    %9 = arith.cmpi slt, %2, %c0_i32_2 : i32
    %10 = vector.broadcast %9 : i1 to vector<1x256xi1>
    %11 = vector.broadcast %10 : vector<1x256xi1> to vector<1x256xi1>
    %12 = arith.xori %8, %11 : vector<1x256xi1>
    %13 = arith.andi %12, %6 : vector<1x256xi1>
    %14 = vector.broadcast %2 : i32 to vector<1x256xi32>
    %15 = arith.addi %4, %14 : vector<1x256xi32>
    %16 = arith.select %13, %15, %4 : vector<1x256xi1>, vector<1x256xi32>
    %c0_i32_3 = arith.constant 0 : i32
    %17 = vector.broadcast %c0_i32_3 : i32 to vector<1x256xi32>
    %18 = arith.cmpi eq, %16, %17 : vector<1x256xi32>
    %c15_i32 = arith.constant 15 : i32
    %19 = vector.broadcast %c15_i32 : i32 to vector<1x256xi32>
    %20 = arith.cmpi eq, %16, %19 : vector<1x256xi32>
    %c0_i32_4 = arith.constant 0 : i32
    %21 = arith.cmpi eq, %arg0, %c0_i32_4 : i32
    %22 = arith.extui %21 : i1 to i32
    %c0_i32_5 = arith.constant 0 : i32
    %23 = arith.cmpi ne, %22, %c0_i32_5 : i32
    scf.if %23 {
      %cst_131 = arith.constant 0.000000e+00 : f32
      %216 = vector.broadcast %cst_131 : f32 to vector<4x112xf32>
      %c0_132 = arith.constant 0 : index
      %c0_133 = arith.constant 0 : index
      %217 = vector.load %arg7[%c0_132, %c0_133] : memref<4x512xf32, #tpu.memory_space<vmem>>, vector<4x112xf32>
      tpu.vector_store %arg7[%c0_132, %c0_133], %216 {strides = array<i32>} : memref<4x512xf32, #tpu.memory_space<vmem>>, vector<4x112xf32>,
      %cst_134 = arith.constant 0.000000e+00 : f32
      %218 = vector.broadcast %cst_134 : f32 to vector<4x112xf32>
      %c0_135 = arith.constant 0 : index
      %c400 = arith.constant 400 : index
      %219 = vector.load %arg7[%c0_135, %c400] : memref<4x512xf32, #tpu.memory_space<vmem>>, vector<4x112xf32>
      tpu.vector_store %arg7[%c0_135, %c400], %218 {strides = array<i32>} : memref<4x512xf32, #tpu.memory_space<vmem>>, vector<4x112xf32>,
    } else {
    }
    %c0 = arith.constant 0 : index
    %c0_6 = arith.constant 0 : index
    %c0_7 = arith.constant 0 : index
    %24 = vector.load %arg1[%c0, %c0_6, %c0_7] : memref<1x4x256xf32, #tpu.memory_space<vmem>>, vector<1x4x256xf32>
    %25 = vector.shape_cast %24 : vector<1x4x256xf32> to vector<4x256xf32>
    %26 = vector.extract_strided_slice %25 {offsets = [0, 16], sizes = [4, 16], strides = [1, 1]} : vector<4x256xf32> to vector<4x16xf32>
    %c0_8 = arith.constant 0 : index
    %c112 = arith.constant 112 : index
    %27 = vector.load %arg7[%c0_8, %c112] : memref<4x512xf32, #tpu.memory_space<vmem>>, vector<4x16xf32>
    tpu.vector_store %arg7[%c0_8, %c112], %26 {strides = array<i32>} : memref<4x512xf32, #tpu.memory_space<vmem>>, vector<4x16xf32>,
    %c0_9 = arith.constant 0 : index
    %c128 = arith.constant 128 : index
    %28 = vector.load %arg7[%c0_9, %c128] : memref<4x512xf32, #tpu.memory_space<vmem>>, vector<4x256xf32>
    tpu.vector_store %arg7[%c0_9, %c128], %25 {strides = array<i32>} : memref<4x512xf32, #tpu.memory_space<vmem>>, vector<4x256xf32>,
    %29 = vector.extract_strided_slice %25 {offsets = [0, 224], sizes = [4, 16], strides = [1, 1]} : vector<4x256xf32> to vector<4x16xf32>
    %c0_10 = arith.constant 0 : index
    %c384 = arith.constant 384 : index
    %30 = vector.load %arg7[%c0_10, %c384] : memref<4x512xf32, #tpu.memory_space<vmem>>, vector<4x16xf32>
    tpu.vector_store %arg7[%c0_10, %c384], %29 {strides = array<i32>} : memref<4x512xf32, #tpu.memory_space<vmem>>, vector<4x16xf32>,
    %c0_11 = arith.constant 0 : index
    %c111 = arith.constant 111 : index
    %31 = vector.load %arg7[%c0_11, %c111] : memref<4x512xf32, #tpu.memory_space<vmem>>, vector<4x256xf32>
    %c0_12 = arith.constant 0 : index
    %c112_13 = arith.constant 112 : index
    %32 = vector.load %arg7[%c0_12, %c112_13] : memref<4x512xf32, #tpu.memory_space<vmem>>, vector<4x256xf32>
    %c0_14 = arith.constant 0 : index
    %c113 = arith.constant 113 : index
    %33 = vector.load %arg7[%c0_14, %c113] : memref<4x512xf32, #tpu.memory_space<vmem>>, vector<4x256xf32>
    %34 = vector.shape_cast %18 : vector<1x256xi1> to vector<1x256xi1>
    %35 = vector.broadcast %34 : vector<1x256xi1> to vector<4x256xi1>
    %36 = arith.select %35, %33, %31 : vector<4x256xi1>, vector<4x256xf32>
    %37 = vector.shape_cast %20 : vector<1x256xi1> to vector<1x256xi1>
    %38 = vector.broadcast %37 : vector<1x256xi1> to vector<4x256xi1>
    %39 = arith.select %38, %31, %33 : vector<4x256xi1>, vector<4x256xf32>
    %c0_15 = arith.constant 0 : index
    %c127 = arith.constant 127 : index
    %40 = vector.load %arg7[%c0_15, %c127] : memref<4x512xf32, #tpu.memory_space<vmem>>, vector<4x256xf32>
    %c0_16 = arith.constant 0 : index
    %c128_17 = arith.constant 128 : index
    %41 = vector.load %arg7[%c0_16, %c128_17] : memref<4x512xf32, #tpu.memory_space<vmem>>, vector<4x256xf32>
    %c0_18 = arith.constant 0 : index
    %c129 = arith.constant 129 : index
    %42 = vector.load %arg7[%c0_18, %c129] : memref<4x512xf32, #tpu.memory_space<vmem>>, vector<4x256xf32>
    %43 = vector.shape_cast %18 : vector<1x256xi1> to vector<1x256xi1>
    %44 = vector.broadcast %43 : vector<1x256xi1> to vector<4x256xi1>
    %45 = arith.select %44, %42, %40 : vector<4x256xi1>, vector<4x256xf32>
    %46 = vector.shape_cast %20 : vector<1x256xi1> to vector<1x256xi1>
    %47 = vector.broadcast %46 : vector<1x256xi1> to vector<4x256xi1>
    %48 = arith.select %47, %40, %42 : vector<4x256xi1>, vector<4x256xf32>
    %c0_19 = arith.constant 0 : index
    %c143 = arith.constant 143 : index
    %49 = vector.load %arg7[%c0_19, %c143] : memref<4x512xf32, #tpu.memory_space<vmem>>, vector<4x256xf32>
    %c0_20 = arith.constant 0 : index
    %c144 = arith.constant 144 : index
    %50 = vector.load %arg7[%c0_20, %c144] : memref<4x512xf32, #tpu.memory_space<vmem>>, vector<4x256xf32>
    %c0_21 = arith.constant 0 : index
    %c145 = arith.constant 145 : index
    %51 = vector.load %arg7[%c0_21, %c145] : memref<4x512xf32, #tpu.memory_space<vmem>>, vector<4x256xf32>
    %52 = vector.shape_cast %18 : vector<1x256xi1> to vector<1x256xi1>
    %53 = vector.broadcast %52 : vector<1x256xi1> to vector<4x256xi1>
    %54 = arith.select %53, %51, %49 : vector<4x256xi1>, vector<4x256xf32>
    %55 = vector.shape_cast %20 : vector<1x256xi1> to vector<1x256xi1>
    %56 = vector.broadcast %55 : vector<1x256xi1> to vector<4x256xi1>
    %57 = arith.select %56, %49, %51 : vector<4x256xi1>, vector<4x256xf32>
    %cst = arith.constant 0.000000e+00 : f32
    %58 = vector.broadcast %cst : f32 to vector<4x256xf32>
    %c0_22 = arith.constant 0 : index
    %c0_23 = arith.constant 0 : index
    %c0_24 = arith.constant 0 : index
    %59 = vector.load %arg2[%c0_22, %c0_23, %c0_24] : memref<9x4x4xf32, #tpu.memory_space<vmem>>, vector<1x4x4xf32>
    %60 = vector.shape_cast %59 : vector<1x4x4xf32> to vector<4x4xf32>
    %cst_25 = arith.constant dense<0.000000e+00> : vector<4x256xf32>
    %61 = tpu.matmul %60, %36, %cst_25 {dimension_numbers = #tpu.dot_dimension_numbers<[1], [0], [0], [1], [0, 0, 1, 1], [], []>} : vector<4x4xf32>, vector<4x256xf32>, vector<4x256xf32> -> vector<4x256xf32>
    %62 = arith.addf %58, %61 : vector<4x256xf32>
    %c1 = arith.constant 1 : index
    %c0_26 = arith.constant 0 : index
    %c0_27 = arith.constant 0 : index
    %63 = vector.load %arg2[%c1, %c0_26, %c0_27] : memref<9x4x4xf32, #tpu.memory_space<vmem>>, vector<1x4x4xf32>
    %64 = vector.shape_cast %63 : vector<1x4x4xf32> to vector<4x4xf32>
    %cst_28 = arith.constant dense<0.000000e+00> : vector<4x256xf32>
    %65 = tpu.matmul %64, %32, %cst_28 {dimension_numbers = #tpu.dot_dimension_numbers<[1], [0], [0], [1], [0, 0, 1, 1], [], []>} : vector<4x4xf32>, vector<4x256xf32>, vector<4x256xf32> -> vector<4x256xf32>
    %66 = arith.addf %62, %65 : vector<4x256xf32>
    %c2 = arith.constant 2 : index
    %c0_29 = arith.constant 0 : index
    %c0_30 = arith.constant 0 : index
    %67 = vector.load %arg2[%c2, %c0_29, %c0_30] : memref<9x4x4xf32, #tpu.memory_space<vmem>>, vector<1x4x4xf32>
    %68 = vector.shape_cast %67 : vector<1x4x4xf32> to vector<4x4xf32>
    %cst_31 = arith.constant dense<0.000000e+00> : vector<4x256xf32>
    %69 = tpu.matmul %68, %39, %cst_31 {dimension_numbers = #tpu.dot_dimension_numbers<[1], [0], [0], [1], [0, 0, 1, 1], [], []>} : vector<4x4xf32>, vector<4x256xf32>, vector<4x256xf32> -> vector<4x256xf32>
    %70 = arith.addf %66, %69 : vector<4x256xf32>
    %c3 = arith.constant 3 : index
    %c0_32 = arith.constant 0 : index
    %c0_33 = arith.constant 0 : index
    %71 = vector.load %arg2[%c3, %c0_32, %c0_33] : memref<9x4x4xf32, #tpu.memory_space<vmem>>, vector<1x4x4xf32>
    %72 = vector.shape_cast %71 : vector<1x4x4xf32> to vector<4x4xf32>
    %cst_34 = arith.constant dense<0.000000e+00> : vector<4x256xf32>
    %73 = tpu.matmul %72, %45, %cst_34 {dimension_numbers = #tpu.dot_dimension_numbers<[1], [0], [0], [1], [0, 0, 1, 1], [], []>} : vector<4x4xf32>, vector<4x256xf32>, vector<4x256xf32> -> vector<4x256xf32>
    %74 = arith.addf %70, %73 : vector<4x256xf32>
    %c4 = arith.constant 4 : index
    %c0_35 = arith.constant 0 : index
    %c0_36 = arith.constant 0 : index
    %75 = vector.load %arg2[%c4, %c0_35, %c0_36] : memref<9x4x4xf32, #tpu.memory_space<vmem>>, vector<1x4x4xf32>
    %76 = vector.shape_cast %75 : vector<1x4x4xf32> to vector<4x4xf32>
    %cst_37 = arith.constant dense<0.000000e+00> : vector<4x256xf32>
    %77 = tpu.matmul %76, %41, %cst_37 {dimension_numbers = #tpu.dot_dimension_numbers<[1], [0], [0], [1], [0, 0, 1, 1], [], []>} : vector<4x4xf32>, vector<4x256xf32>, vector<4x256xf32> -> vector<4x256xf32>
    %78 = arith.addf %74, %77 : vector<4x256xf32>
    %c5 = arith.constant 5 : index
    %c0_38 = arith.constant 0 : index
    %c0_39 = arith.constant 0 : index
    %79 = vector.load %arg2[%c5, %c0_38, %c0_39] : memref<9x4x4xf32, #tpu.memory_space<vmem>>, vector<1x4x4xf32>
    %80 = vector.shape_cast %79 : vector<1x4x4xf32> to vector<4x4xf32>
    %cst_40 = arith.constant dense<0.000000e+00> : vector<4x256xf32>
    %81 = tpu.matmul %80, %48, %cst_40 {dimension_numbers = #tpu.dot_dimension_numbers<[1], [0], [0], [1], [0, 0, 1, 1], [], []>} : vector<4x4xf32>, vector<4x256xf32>, vector<4x256xf32> -> vector<4x256xf32>
    %82 = arith.addf %78, %81 : vector<4x256xf32>
    %c6 = arith.constant 6 : index
    %c0_41 = arith.constant 0 : index
    %c0_42 = arith.constant 0 : index
    %83 = vector.load %arg2[%c6, %c0_41, %c0_42] : memref<9x4x4xf32, #tpu.memory_space<vmem>>, vector<1x4x4xf32>
    %84 = vector.shape_cast %83 : vector<1x4x4xf32> to vector<4x4xf32>
    %cst_43 = arith.constant dense<0.000000e+00> : vector<4x256xf32>
    %85 = tpu.matmul %84, %54, %cst_43 {dimension_numbers = #tpu.dot_dimension_numbers<[1], [0], [0], [1], [0, 0, 1, 1], [], []>} : vector<4x4xf32>, vector<4x256xf32>, vector<4x256xf32> -> vector<4x256xf32>
    %86 = arith.addf %82, %85 : vector<4x256xf32>
    %c7 = arith.constant 7 : index
    %c0_44 = arith.constant 0 : index
    %c0_45 = arith.constant 0 : index
    %87 = vector.load %arg2[%c7, %c0_44, %c0_45] : memref<9x4x4xf32, #tpu.memory_space<vmem>>, vector<1x4x4xf32>
    %88 = vector.shape_cast %87 : vector<1x4x4xf32> to vector<4x4xf32>
    %cst_46 = arith.constant dense<0.000000e+00> : vector<4x256xf32>
    %89 = tpu.matmul %88, %50, %cst_46 {dimension_numbers = #tpu.dot_dimension_numbers<[1], [0], [0], [1], [0, 0, 1, 1], [], []>} : vector<4x4xf32>, vector<4x256xf32>, vector<4x256xf32> -> vector<4x256xf32>
    %90 = arith.addf %86, %89 : vector<4x256xf32>
    %c8 = arith.constant 8 : index
    %c0_47 = arith.constant 0 : index
    %c0_48 = arith.constant 0 : index
    %91 = vector.load %arg2[%c8, %c0_47, %c0_48] : memref<9x4x4xf32, #tpu.memory_space<vmem>>, vector<1x4x4xf32>
    %92 = vector.shape_cast %91 : vector<1x4x4xf32> to vector<4x4xf32>
    %cst_49 = arith.constant dense<0.000000e+00> : vector<4x256xf32>
    %93 = tpu.matmul %92, %57, %cst_49 {dimension_numbers = #tpu.dot_dimension_numbers<[1], [0], [0], [1], [0, 0, 1, 1], [], []>} : vector<4x4xf32>, vector<4x256xf32>, vector<4x256xf32> -> vector<4x256xf32>
    %94 = arith.addf %90, %93 : vector<4x256xf32>
    %c0_50 = arith.constant 0 : index
    %c0_51 = arith.constant 0 : index
    %95 = vector.load %arg3[%c0_50, %c0_51] : memref<4x1xf32, #tpu.memory_space<vmem>>, vector<4x1xf32>
    %96 = vector.broadcast %95 : vector<4x1xf32> to vector<4x256xf32>
    %97 = arith.addf %94, %96 : vector<4x256xf32>
    %cst_52 = arith.constant dense<0.000000e+00> : vector<4xf32>
    %98 = vector.multi_reduction <add>, %97, %cst_52 [1] : vector<4x256xf32> to vector<4xf32>
    %99 = vector.shape_cast %98 : vector<4xf32> to vector<4x1xf32>
    %cst_53 = arith.constant 3.906250e-03 : f32
    %100 = vector.broadcast %cst_53 : f32 to vector<4x1xf32>
    %101 = arith.mulf %99, %100 : vector<4x1xf32>
    %102 = arith.mulf %97, %97 : vector<4x256xf32>
    %cst_54 = arith.constant dense<0.000000e+00> : vector<4xf32>
    %103 = vector.multi_reduction <add>, %102, %cst_54 [1] : vector<4x256xf32> to vector<4xf32>
    %104 = vector.shape_cast %103 : vector<4xf32> to vector<4x1xf32>
    %cst_55 = arith.constant 3.906250e-03 : f32
    %105 = vector.broadcast %cst_55 : f32 to vector<4x1xf32>
    %106 = arith.mulf %104, %105 : vector<4x1xf32>
    %107 = arith.mulf %101, %101 : vector<4x1xf32>
    %108 = arith.subf %106, %107 : vector<4x1xf32>
    %cst_56 = arith.constant 0.000000e+00 : f32
    %109 = vector.broadcast %cst_56 : f32 to vector<4x1xf32>
    %110 = arith.maximumf %108, %109 : vector<4x1xf32>
    %111 = vector.broadcast %101 : vector<4x1xf32> to vector<4x256xf32>
    %112 = arith.subf %97, %111 : vector<4x256xf32>
    %cst_57 = arith.constant 9.99999974E-6 : f32
    %113 = vector.broadcast %cst_57 : f32 to vector<4x1xf32>
    %114 = arith.addf %110, %113 : vector<4x1xf32>
    %115 = math.rsqrt %114 : vector<4x1xf32>
    %116 = vector.broadcast %115 : vector<4x1xf32> to vector<4x256xf32>
    %117 = arith.mulf %112, %116 : vector<4x256xf32>
    %cst_58 = arith.constant 0.000000e+00 : f32
    %118 = vector.broadcast %cst_58 : f32 to vector<4x256xf32>
    %119 = arith.maximumf %117, %118 : vector<4x256xf32>
    %120 = vector.extract_strided_slice %119 {offsets = [0, 16], sizes = [4, 16], strides = [1, 1]} : vector<4x256xf32> to vector<4x16xf32>
    %c0_59 = arith.constant 0 : index
    %c112_60 = arith.constant 112 : index
    %121 = vector.load %arg7[%c0_59, %c112_60] : memref<4x512xf32, #tpu.memory_space<vmem>>, vector<4x16xf32>
    tpu.vector_store %arg7[%c0_59, %c112_60], %120 {strides = array<i32>} : memref<4x512xf32, #tpu.memory_space<vmem>>, vector<4x16xf32>,
    %c0_61 = arith.constant 0 : index
    %c128_62 = arith.constant 128 : index
    %122 = vector.load %arg7[%c0_61, %c128_62] : memref<4x512xf32, #tpu.memory_space<vmem>>, vector<4x256xf32>
    tpu.vector_store %arg7[%c0_61, %c128_62], %119 {strides = array<i32>} : memref<4x512xf32, #tpu.memory_space<vmem>>, vector<4x256xf32>,
    %123 = vector.extract_strided_slice %119 {offsets = [0, 224], sizes = [4, 16], strides = [1, 1]} : vector<4x256xf32> to vector<4x16xf32>
    %c0_63 = arith.constant 0 : index
    %c384_64 = arith.constant 384 : index
    %124 = vector.load %arg7[%c0_63, %c384_64] : memref<4x512xf32, #tpu.memory_space<vmem>>, vector<4x16xf32>
    tpu.vector_store %arg7[%c0_63, %c384_64], %123 {strides = array<i32>} : memref<4x512xf32, #tpu.memory_space<vmem>>, vector<4x16xf32>,
    %c0_65 = arith.constant 0 : index
    %c111_66 = arith.constant 111 : index
    %125 = vector.load %arg7[%c0_65, %c111_66] : memref<4x512xf32, #tpu.memory_space<vmem>>, vector<4x256xf32>
    %c0_67 = arith.constant 0 : index
    %c112_68 = arith.constant 112 : index
    %126 = vector.load %arg7[%c0_67, %c112_68] : memref<4x512xf32, #tpu.memory_space<vmem>>, vector<4x256xf32>
    %c0_69 = arith.constant 0 : index
    %c113_70 = arith.constant 113 : index
    %127 = vector.load %arg7[%c0_69, %c113_70] : memref<4x512xf32, #tpu.memory_space<vmem>>, vector<4x256xf32>
    %128 = vector.shape_cast %18 : vector<1x256xi1> to vector<1x256xi1>
    %129 = vector.broadcast %128 : vector<1x256xi1> to vector<4x256xi1>
    %130 = arith.select %129, %127, %125 : vector<4x256xi1>, vector<4x256xf32>
    %131 = vector.shape_cast %20 : vector<1x256xi1> to vector<1x256xi1>
    %132 = vector.broadcast %131 : vector<1x256xi1> to vector<4x256xi1>
    %133 = arith.select %132, %125, %127 : vector<4x256xi1>, vector<4x256xf32>
    %c0_71 = arith.constant 0 : index
    %c127_72 = arith.constant 127 : index
    %134 = vector.load %arg7[%c0_71, %c127_72] : memref<4x512xf32, #tpu.memory_space<vmem>>, vector<4x256xf32>
    %c0_73 = arith.constant 0 : index
    %c128_74 = arith.constant 128 : index
    %135 = vector.load %arg7[%c0_73, %c128_74] : memref<4x512xf32, #tpu.memory_space<vmem>>, vector<4x256xf32>
    %c0_75 = arith.constant 0 : index
    %c129_76 = arith.constant 129 : index
    %136 = vector.load %arg7[%c0_75, %c129_76] : memref<4x512xf32, #tpu.memory_space<vmem>>, vector<4x256xf32>
    %137 = vector.shape_cast %18 : vector<1x256xi1> to vector<1x256xi1>
    %138 = vector.broadcast %137 : vector<1x256xi1> to vector<4x256xi1>
    %139 = arith.select %138, %136, %134 : vector<4x256xi1>, vector<4x256xf32>
    %140 = vector.shape_cast %20 : vector<1x256xi1> to vector<1x256xi1>
    %141 = vector.broadcast %140 : vector<1x256xi1> to vector<4x256xi1>
    %142 = arith.select %141, %134, %136 : vector<4x256xi1>, vector<4x256xf32>
    %c0_77 = arith.constant 0 : index
    %c143_78 = arith.constant 143 : index
    %143 = vector.load %arg7[%c0_77, %c143_78] : memref<4x512xf32, #tpu.memory_space<vmem>>, vector<4x256xf32>
    %c0_79 = arith.constant 0 : index
    %c144_80 = arith.constant 144 : index
    %144 = vector.load %arg7[%c0_79, %c144_80] : memref<4x512xf32, #tpu.memory_space<vmem>>, vector<4x256xf32>
    %c0_81 = arith.constant 0 : index
    %c145_82 = arith.constant 145 : index
    %145 = vector.load %arg7[%c0_81, %c145_82] : memref<4x512xf32, #tpu.memory_space<vmem>>, vector<4x256xf32>
    %146 = vector.shape_cast %18 : vector<1x256xi1> to vector<1x256xi1>
    %147 = vector.broadcast %146 : vector<1x256xi1> to vector<4x256xi1>
    %148 = arith.select %147, %145, %143 : vector<4x256xi1>, vector<4x256xf32>
    %149 = vector.shape_cast %20 : vector<1x256xi1> to vector<1x256xi1>
    %150 = vector.broadcast %149 : vector<1x256xi1> to vector<4x256xi1>
    %151 = arith.select %150, %143, %145 : vector<4x256xi1>, vector<4x256xf32>
    %cst_83 = arith.constant 0.000000e+00 : f32
    %152 = vector.broadcast %cst_83 : f32 to vector<4x256xf32>
    %c0_84 = arith.constant 0 : index
    %c0_85 = arith.constant 0 : index
    %c0_86 = arith.constant 0 : index
    %153 = vector.load %arg4[%c0_84, %c0_85, %c0_86] : memref<9x4x4xf32, #tpu.memory_space<vmem>>, vector<1x4x4xf32>
    %154 = vector.shape_cast %153 : vector<1x4x4xf32> to vector<4x4xf32>
    %cst_87 = arith.constant dense<0.000000e+00> : vector<4x256xf32>
    %155 = tpu.matmul %154, %130, %cst_87 {dimension_numbers = #tpu.dot_dimension_numbers<[1], [0], [0], [1], [0, 0, 1, 1], [], []>} : vector<4x4xf32>, vector<4x256xf32>, vector<4x256xf32> -> vector<4x256xf32>
    %156 = arith.addf %152, %155 : vector<4x256xf32>
    %c1_88 = arith.constant 1 : index
    %c0_89 = arith.constant 0 : index
    %c0_90 = arith.constant 0 : index
    %157 = vector.load %arg4[%c1_88, %c0_89, %c0_90] : memref<9x4x4xf32, #tpu.memory_space<vmem>>, vector<1x4x4xf32>
    %158 = vector.shape_cast %157 : vector<1x4x4xf32> to vector<4x4xf32>
    %cst_91 = arith.constant dense<0.000000e+00> : vector<4x256xf32>
    %159 = tpu.matmul %158, %126, %cst_91 {dimension_numbers = #tpu.dot_dimension_numbers<[1], [0], [0], [1], [0, 0, 1, 1], [], []>} : vector<4x4xf32>, vector<4x256xf32>, vector<4x256xf32> -> vector<4x256xf32>
    %160 = arith.addf %156, %159 : vector<4x256xf32>
    %c2_92 = arith.constant 2 : index
    %c0_93 = arith.constant 0 : index
    %c0_94 = arith.constant 0 : index
    %161 = vector.load %arg4[%c2_92, %c0_93, %c0_94] : memref<9x4x4xf32, #tpu.memory_space<vmem>>, vector<1x4x4xf32>
    %162 = vector.shape_cast %161 : vector<1x4x4xf32> to vector<4x4xf32>
    %cst_95 = arith.constant dense<0.000000e+00> : vector<4x256xf32>
    %163 = tpu.matmul %162, %133, %cst_95 {dimension_numbers = #tpu.dot_dimension_numbers<[1], [0], [0], [1], [0, 0, 1, 1], [], []>} : vector<4x4xf32>, vector<4x256xf32>, vector<4x256xf32> -> vector<4x256xf32>
    %164 = arith.addf %160, %163 : vector<4x256xf32>
    %c3_96 = arith.constant 3 : index
    %c0_97 = arith.constant 0 : index
    %c0_98 = arith.constant 0 : index
    %165 = vector.load %arg4[%c3_96, %c0_97, %c0_98] : memref<9x4x4xf32, #tpu.memory_space<vmem>>, vector<1x4x4xf32>
    %166 = vector.shape_cast %165 : vector<1x4x4xf32> to vector<4x4xf32>
    %cst_99 = arith.constant dense<0.000000e+00> : vector<4x256xf32>
    %167 = tpu.matmul %166, %139, %cst_99 {dimension_numbers = #tpu.dot_dimension_numbers<[1], [0], [0], [1], [0, 0, 1, 1], [], []>} : vector<4x4xf32>, vector<4x256xf32>, vector<4x256xf32> -> vector<4x256xf32>
    %168 = arith.addf %164, %167 : vector<4x256xf32>
    %c4_100 = arith.constant 4 : index
    %c0_101 = arith.constant 0 : index
    %c0_102 = arith.constant 0 : index
    %169 = vector.load %arg4[%c4_100, %c0_101, %c0_102] : memref<9x4x4xf32, #tpu.memory_space<vmem>>, vector<1x4x4xf32>
    %170 = vector.shape_cast %169 : vector<1x4x4xf32> to vector<4x4xf32>
    %cst_103 = arith.constant dense<0.000000e+00> : vector<4x256xf32>
    %171 = tpu.matmul %170, %135, %cst_103 {dimension_numbers = #tpu.dot_dimension_numbers<[1], [0], [0], [1], [0, 0, 1, 1], [], []>} : vector<4x4xf32>, vector<4x256xf32>, vector<4x256xf32> -> vector<4x256xf32>
    %172 = arith.addf %168, %171 : vector<4x256xf32>
    %c5_104 = arith.constant 5 : index
    %c0_105 = arith.constant 0 : index
    %c0_106 = arith.constant 0 : index
    %173 = vector.load %arg4[%c5_104, %c0_105, %c0_106] : memref<9x4x4xf32, #tpu.memory_space<vmem>>, vector<1x4x4xf32>
    %174 = vector.shape_cast %173 : vector<1x4x4xf32> to vector<4x4xf32>
    %cst_107 = arith.constant dense<0.000000e+00> : vector<4x256xf32>
    %175 = tpu.matmul %174, %142, %cst_107 {dimension_numbers = #tpu.dot_dimension_numbers<[1], [0], [0], [1], [0, 0, 1, 1], [], []>} : vector<4x4xf32>, vector<4x256xf32>, vector<4x256xf32> -> vector<4x256xf32>
    %176 = arith.addf %172, %175 : vector<4x256xf32>
    %c6_108 = arith.constant 6 : index
    %c0_109 = arith.constant 0 : index
    %c0_110 = arith.constant 0 : index
    %177 = vector.load %arg4[%c6_108, %c0_109, %c0_110] : memref<9x4x4xf32, #tpu.memory_space<vmem>>, vector<1x4x4xf32>
    %178 = vector.shape_cast %177 : vector<1x4x4xf32> to vector<4x4xf32>
    %cst_111 = arith.constant dense<0.000000e+00> : vector<4x256xf32>
    %179 = tpu.matmul %178, %148, %cst_111 {dimension_numbers = #tpu.dot_dimension_numbers<[1], [0], [0], [1], [0, 0, 1, 1], [], []>} : vector<4x4xf32>, vector<4x256xf32>, vector<4x256xf32> -> vector<4x256xf32>
    %180 = arith.addf %176, %179 : vector<4x256xf32>
    %c7_112 = arith.constant 7 : index
    %c0_113 = arith.constant 0 : index
    %c0_114 = arith.constant 0 : index
    %181 = vector.load %arg4[%c7_112, %c0_113, %c0_114] : memref<9x4x4xf32, #tpu.memory_space<vmem>>, vector<1x4x4xf32>
    %182 = vector.shape_cast %181 : vector<1x4x4xf32> to vector<4x4xf32>
    %cst_115 = arith.constant dense<0.000000e+00> : vector<4x256xf32>
    %183 = tpu.matmul %182, %144, %cst_115 {dimension_numbers = #tpu.dot_dimension_numbers<[1], [0], [0], [1], [0, 0, 1, 1], [], []>} : vector<4x4xf32>, vector<4x256xf32>, vector<4x256xf32> -> vector<4x256xf32>
    %184 = arith.addf %180, %183 : vector<4x256xf32>
    %c8_116 = arith.constant 8 : index
    %c0_117 = arith.constant 0 : index
    %c0_118 = arith.constant 0 : index
    %185 = vector.load %arg4[%c8_116, %c0_117, %c0_118] : memref<9x4x4xf32, #tpu.memory_space<vmem>>, vector<1x4x4xf32>
    %186 = vector.shape_cast %185 : vector<1x4x4xf32> to vector<4x4xf32>
    %cst_119 = arith.constant dense<0.000000e+00> : vector<4x256xf32>
    %187 = tpu.matmul %186, %151, %cst_119 {dimension_numbers = #tpu.dot_dimension_numbers<[1], [0], [0], [1], [0, 0, 1, 1], [], []>} : vector<4x4xf32>, vector<4x256xf32>, vector<4x256xf32> -> vector<4x256xf32>
    %188 = arith.addf %184, %187 : vector<4x256xf32>
    %c0_120 = arith.constant 0 : index
    %c0_121 = arith.constant 0 : index
    %189 = vector.load %arg5[%c0_120, %c0_121] : memref<4x1xf32, #tpu.memory_space<vmem>>, vector<4x1xf32>
    %190 = vector.broadcast %189 : vector<4x1xf32> to vector<4x256xf32>
    %191 = arith.addf %188, %190 : vector<4x256xf32>
    %cst_122 = arith.constant dense<0.000000e+00> : vector<4xf32>
    %192 = vector.multi_reduction <add>, %191, %cst_122 [1] : vector<4x256xf32> to vector<4xf32>
    %193 = vector.shape_cast %192 : vector<4xf32> to vector<4x1xf32>
    %cst_123 = arith.constant 3.906250e-03 : f32
    %194 = vector.broadcast %cst_123 : f32 to vector<4x1xf32>
    %195 = arith.mulf %193, %194 : vector<4x1xf32>
    %196 = arith.mulf %191, %191 : vector<4x256xf32>
    %cst_124 = arith.constant dense<0.000000e+00> : vector<4xf32>
    %197 = vector.multi_reduction <add>, %196, %cst_124 [1] : vector<4x256xf32> to vector<4xf32>
    %198 = vector.shape_cast %197 : vector<4xf32> to vector<4x1xf32>
    %cst_125 = arith.constant 3.906250e-03 : f32
    %199 = vector.broadcast %cst_125 : f32 to vector<4x1xf32>
    %200 = arith.mulf %198, %199 : vector<4x1xf32>
    %201 = arith.mulf %195, %195 : vector<4x1xf32>
    %202 = arith.subf %200, %201 : vector<4x1xf32>
    %cst_126 = arith.constant 0.000000e+00 : f32
    %203 = vector.broadcast %cst_126 : f32 to vector<4x1xf32>
    %204 = arith.maximumf %202, %203 : vector<4x1xf32>
    %205 = vector.broadcast %195 : vector<4x1xf32> to vector<4x256xf32>
    %206 = arith.subf %191, %205 : vector<4x256xf32>
    %cst_127 = arith.constant 9.99999974E-6 : f32
    %207 = vector.broadcast %cst_127 : f32 to vector<4x1xf32>
    %208 = arith.addf %204, %207 : vector<4x1xf32>
    %209 = math.rsqrt %208 : vector<4x1xf32>
    %210 = vector.broadcast %209 : vector<4x1xf32> to vector<4x256xf32>
    %211 = arith.mulf %206, %210 : vector<4x256xf32>
    %212 = arith.addf %25, %211 : vector<4x256xf32>
    %c0_128 = arith.constant 0 : index
    %c0_129 = arith.constant 0 : index
    %c0_130 = arith.constant 0 : index
    %213 = vector.load %arg6[%c0_128, %c0_129, %c0_130] : memref<1x4x256xf32, #tpu.memory_space<vmem>>, vector<1x4x256xf32>
    %214 = vector.shape_cast %213 : vector<1x4x256xf32> to vector<4x256xf32>
    %215 = vector.shape_cast %212 : vector<4x256xf32> to vector<1x4x256xf32>
    tpu.vector_store %arg6[%c0_128, %c0_129, %c0_130], %215 {strides = array<i32>} : memref<1x4x256xf32, #tpu.memory_space<vmem>>, vector<1x4x256xf32>,
    return
  }
  func.func @transform_0(%arg0: i32) -> (i32, i32, i32) {
    %c0_i32 = arith.constant 0 : i32
    %c0_i32_0 = arith.constant 0 : i32
    %c0_i32_1 = arith.constant 0 : i32
    return %arg0, %c0_i32, %c0_i32_0 : i32, i32, i32
  }
  func.func @transform_1(%arg0: i32) -> (i32, i32, i32) {
    %c0_i32 = arith.constant 0 : i32
    %c0_i32_0 = arith.constant 0 : i32
    %c0_i32_1 = arith.constant 0 : i32
    %c0_i32_2 = arith.constant 0 : i32
    return %c0_i32, %c0_i32_0, %c0_i32_1 : i32, i32, i32
  }
  func.func @transform_2(%arg0: i32) -> (i32, i32) {
    %c0_i32 = arith.constant 0 : i32
    %c0_i32_0 = arith.constant 0 : i32
    %c0_i32_1 = arith.constant 0 : i32
    return %c0_i32, %c0_i32_0 : i32, i32
  }
  func.func @transform_3(%arg0: i32) -> (i32, i32, i32) {
    %c0_i32 = arith.constant 0 : i32
    %c0_i32_0 = arith.constant 0 : i32
    %c0_i32_1 = arith.constant 0 : i32
    %c0_i32_2 = arith.constant 0 : i32
    return %c0_i32, %c0_i32_0, %c0_i32_1 : i32, i32, i32
  }
  func.func @transform_4(%arg0: i32) -> (i32, i32) {
    %c0_i32 = arith.constant 0 : i32
    %c0_i32_0 = arith.constant 0 : i32
    %c0_i32_1 = arith.constant 0 : i32
    return %c0_i32, %c0_i32_0 : i32, i32
  }
  func.func @transform_5(%arg0: i32) -> (i32, i32, i32) {
    %c0_i32 = arith.constant 0 : i32
    %c0_i32_0 = arith.constant 0 : i32
    %c0_i32_1 = arith.constant 0 : i32
    return %arg0, %c0_i32, %c0_i32_0 : i32, i32, i32
  }
}

</mosaic_0001>

<bundles_post_ra>
// kernel: resnet_block_nchw.1
= control target key start
LH: loop header
LB: loop body
LE: loop exit
PB: predicated region body
PF: predicated region fallthrough
CT: control target
= control target key end

     0   :  { %s2322_s18 = smov 0   ;;  %s2669_s0 = inlined_call_operand.vmem [shape: f32[2,4,256], index: 0, kind: input, shape index: {}]   ;;  %s2670_s1 = inlined_call_operand.vmem [shape: f32[9,4,4], index: 1, kind: input, shape index: {}]   ;;  %s2671_s2 = inlined_call_operand.vmem [shape: f32[4,1], index: 2, kind: input, shape index: {}]   ;;  %s2672_s3 = inlined_call_operand.vmem [shape: f32[9,4,4], index: 3, kind: input, shape index: {}]   ;;  %s2673_s4 = inlined_call_operand.vmem [shape: f32[4,1], index: 4, kind: input, shape index: {}]   ;;  %s2674_s5 = inlined_call_operand.vmem [shape: f32[2,4,256], index: 5, kind: output, shape index: {}]  }
   0x1 LB: > { %s2126_s19 = sadd.s32 4294967295, %s2277_s18   ;;  %p2130_p0 = scmp.ge.s32.totalorder %s2277_s18, 1  ;;  %s2277_s18 = sphi %s2322_s18, %s15_s18  }
   0x2   : > { %p187_p1 = scmp.lt.s32.totalorder %s2277_s18, 3 }
   0x4   : > { %p188_p2 = pnand %p2130_p0, %p187_p1 }
   0x5   : > { %p215_p3 = scmp.lt.s32.totalorder (!%p188_p2), %s2126_s19, 1  ;;  %v225_v0 = vlaneseq (!%p188_p2)  ;;  %p2135_p4 = scmp.ne.s32.totalorder (!%p188_p2), %s2126_s19, 0 }
   0x6   : > { %191 = sbr.rel (%p188_p2) target bundleno = 1418 (0x58a), region = 40 }
   0x7   : > { %v226_v1 = vand.u32 (!%p188_p2), 127, %v225_v0 }
   0x9   : > { %v227_v2 = vadd.s32 (!%p188_p2), 128, %v226_v1  ;;  %v232_v3 = vand.u32 (!%p188_p2), 15, %v226_v1 }
   0xb   : > { %v239_v4 = vand.u32 (!%p188_p2), 15, %v227_v2  ;;  %vm2338_vm0 = vcmp.eq.s32.totalorder (!%p188_p2), %v232_v3, 0  ;;  %vm2342_vm1 = vcmp.eq.s32.totalorder (!%p188_p2), %v232_v3, 15 }
   0xd   : > { %s216_s20 = scalar_select %p215_p3, %s2126_s19, 1  ;;  %vm2346_vm2 = vcmp.eq.s32.totalorder %v239_v4, 0  ;;  %vm2350_vm3 = vcmp.eq.s32.totalorder %v239_v4, 15 }
   0xe   : > { %259 = sbr.rel (%p2135_p4) target bundleno = 21 (0x15), region = 44  ;;  %vm260_vm4 = vcmask (!%p2135_p4), 912384   ;;  %vm262_vm5 = vcmask (!%p2135_p4), 1043584   ;;  %v2279_v9 = vmov (!%p2135_p4), 0.0  }
   0xf   : > { %s2208_s21 = sshll.u32 %s216_s20, 3  ;;  %261 = vst.msk [vmem:[#allocation2] sm:$0xf] (!%p2135_p4), %vm260_vm4, %v2279_v9 }
  0x10   : > { %s219_s24 = scalar_lea.vmem %s2669_s0, %s2208_s21  ;;  %s2336_s27 = scalar_lea.vmem %s2674_s5, %s2208_s21  ;;  %263 = vst.msk [vmem:[#allocation2 + $0xc] sm:$0xf] (!%p2135_p4), %vm262_vm5, %v2279_v9 }
  0x15 PF: > { %v2354_v10 = vld [vmem:[%s219_s24] sm:$0xff]  ;;  %s2280_s28 = smov 96   ;;  %s2281_s29 = smov 32   ;;  %vm269_vm6 = vcmask 1044352   ;;  %vm276_vm7 = vcmask 125952   ;;  %v2284_v14 = vmov 0.0  }
  0x16   : > { %266 = vrot.lane.b32.xlu0 %v2354_v10, %s2280_s28  ;;  %271 = vst [vmem:[#allocation2 + $0x4] sm:$0xff] %v2354_v10  ;;  %s2282_s30 = smov 15   ;;  %s2283_s6 = smov 16   ;;  %460 = vmatprep.mubr.f32.mxu0 %v2284_v14  ;;  %v2377_v19 = vcombine.high %v2354_v10, %v2354_v10  ;;  %v1142_v20 = vld [vmem:[%s2671_s2] sm:$0xf]  ;;  %v2291_v21 = vmov 0  }
  0x17   : > { %1353 = vmatprep.mubr.f32.mxu1 %v2284_v14  ;;  %s2285_s7 = smov 17   ;;  %s2286_s8 = smov 1   ;;  %2263 = vset.pattern.permute.xlu0 %v2291_v21  ;;  %vm384_vm8 = vcmask 130048   ;;  %vm391_vm9 = vcmask 1043456   ;;  %v2136_v28 = vld [vmem:[%s2670_s1 + $0x4] sm:$0xf] }
  0x18   : > { %s2287_s9 = smov 127   ;;  %s2288_s10 = smov 111   ;;  %vm387_vm10 = vcmask 31744   ;;  %vm293_vm11 = vcmask 121856   ;;  %vm304_vm12 = vcmask 138240   ;;  %vm329_vm13 = vcmask 1039360  }
  0x19   : > { %s2289_s11 = smov 113   ;;  %s2290_s12 = smov 112   ;;  %v375_v40 = vld [vmem:[%s2670_s1] sm:$0xf]  ;;  %vm340_vm14 = vcmask 7168   ;;  %vm366_vm15 = vcmask 924672  }
  0x1a   : > { %272 = vrot.lane.b32.xlu0 %v2354_v10, %s2281_s29  ;;  %v2143_v49 = vld [vmem:[%s2670_s1 + $0x8] sm:$0xf]  ;;  %v2147_v57 = vld [vmem:[%s2670_s1 + $0xc] sm:$0xf]  ;;  %vm355_vm4 = vcmask 908288   ;;  %vm975_vm5 = vcmask 916480  }
  0x1b   : > { %v2151_v62 = vld [vmem:[%s2670_s1 + $0x10] sm:$0xf]  ;;  %v2202_v8 = vld [vmem:[%s2672_s3 + $0x20] sm:$0xf] }
  0x1d   : > { %v279_v11 = vld [vmem:[#allocation2 + $0x8] sm:$0xf] }
  0x1e   : > { %291 = vrot.lane.b32.xlu0 %v279_v11, %s2282_s30  ;;  %382 = vrot.lane.b32.xlu1 %v279_v11, %s2283_s6 }
  0x88   : > { %v267_v12 = vpop.permute.xlu0 %266 }
  0x89   : > { %270 = vst.msk [vmem:[#allocation2] sm:$0xf] %vm269_vm6, %v267_v12  ;;  %v2155_v12 = vld [vmem:[%s2670_s1 + $0x14] sm:$0xf] }
  0x8c   : > { %v273_v13 = vpop.permute.xlu0 %272 }
  0x8d   : > { %v274_v15 = vrot.slane %v273_v13, 4 }
  0x8f   : > { %277 = vst.msk [vmem:[#allocation2 + $0xc] sm:$0xf] %vm276_vm7, %v274_v15 }
  0x90   : > { %v278_v16 = vld [vmem:[#allocation2] sm:$0xff]  ;;  %v292_v22 = vpop.permute.xlu0 %291  ;;  %v383_v23 = vpop.permute.xlu1 %382 }
  0x91   : > { %378 = vrot.lane.b32.xlu0 %v278_v16, %s2283_s6  ;;  %v286_v17 = vcombine.high %v278_v16, %v278_v16 }
  0x93   : > { %380 = vrot.lane.b32.xlu1 %v286_v17, %s2283_s6 }
  0x95   : > { %302 = vrot.lane.b32.xlu0 %v279_v11, %s2285_s7 }
  0x96   : > { %v319_v18 = vld [vmem:[#allocation2 + $0xc] sm:$0xf] }
  0x97   : > { %289 = vrot.lane.b32.xlu1 %v286_v17, %s2282_s30 }
  0x99   : > { %298 = vrot.lane.b32.xlu0 %v278_v16, %s2285_s7 }
  0x9b   : > { %300 = vrot.lane.b32.xlu1 %v286_v17, %s2285_s7 }
  0x9d   : > { %338 = vrot.lane.b32.xlu0 %v279_v11, %s2286_s8 }
  0x9f   : > { %287 = vrot.lane.b32.xlu1 %v278_v16, %s2282_s30 }
  0xa1   : > { %327 = vrot.lane.b32.xlu0 %v319_v18, %s2287_s9 }
  0xa3   : > { %325 = vrot.lane.b32.xlu1 %v2377_v19, %s2287_s9 }
  0xa5   : > { %334 = vrot.lane.b32.xlu0 %v278_v16, %s2286_s8 }
  0xa7   : > { %336 = vrot.lane.b32.xlu1 %v286_v17, %s2286_s8 }
  0xa9   : > { %353 = vrot.lane.b32.xlu0 %v319_v18, %s2288_s10 }
  0xab   : > { %323 = vrot.lane.b32.xlu1 %v2354_v10, %s2287_s9 }
  0xad   : > { %364 = vrot.lane.b32.xlu0 %v319_v18, %s2289_s11 }
  0xaf   : > { %351 = vrot.lane.b32.xlu1 %v2377_v19, %s2288_s10 }
  0xb1   : > { %360 = vrot.lane.b32.xlu0 %v2354_v10, %s2289_s11 }
  0xb3   : > { %362 = vrot.lane.b32.xlu1 %v2377_v19, %s2289_s11 }
  0xb5   : > { %973 = vrot.lane.b32.xlu0 %v319_v18, %s2290_s12 }
  0xb7   : > { %349 = vrot.lane.b32.xlu1 %v2354_v10, %s2288_s10 }
  0xb9   : > { %1145 = vperm.xlu0 %2263, %v1142_v20  }
  0xbb   : > { %971 = vrot.lane.b32.xlu1 %v2377_v19, %s2290_s12 }
  0xbf   : > { %969 = vrot.lane.b32.xlu1 %v2354_v10, %s2290_s12 }
 0x103   : > { %v379_v24 = vpop.permute.xlu0 %378 }
 0x105   : > { %v381_v25 = vpop.permute.xlu1 %380 }
 0x106   : > { %v386_v26 = vsel %vm384_vm8, %v381_v25, %v383_v23  ;;  %v385_v27 = vsel %vm384_vm8, %v379_v24, %v381_v25  ;;  %v2167_v24 = vld [vmem:[%s2670_s1 + $0x20] sm:$0xf] }
 0x107   : > { %v303_v29 = vpop.permute.xlu0 %302  ;;  %2137 = vmatprep.subr.msk.mxu0 %vm391_vm9, %v386_v26 }
 0x108   : > { %2138 = vmatpush1.msk.msra.mxu0 %vm391_vm9, %v385_v27 }
 0x109   : > { %v290_v30 = vpop.permute.xlu1 %289  ;;  %2139 = vmatmul.mubr.msk.f32.vlgmr.msra.gmra.mrb[0].mxu0 %vm387_vm10, %v2136_v28 }
 0x10a   : > { %540 = vmatprep.mubr.f32.mxu0 %v2284_v14  ;;  %v295_v33 = vsel %vm293_vm11, %v290_v30, %v292_v22  ;;  %v2163_v22 = vld [vmem:[%s2670_s1 + $0x1c] sm:$0xf] }
 0x10b   : > { %v299_v31 = vpop.permute.xlu0 %298 }
 0x10d   : > { %v301_v32 = vpop.permute.xlu1 %300 }
 0x10e   : > { %v306_v34 = vsel %vm304_vm12, %v301_v32, %v303_v29  ;;  %v305_v38 = vsel %vm304_vm12, %v299_v31, %v301_v32 }
 0x10f   : > { %v310_v35 = vsel %vm2346_vm2, %v295_v33, %v306_v34  ;;  %v339_v36 = vpop.permute.xlu0 %338  ;;  %v316_v42 = vsel %vm2350_vm3, %v306_v34, %v295_v33 }
 0x110   : > { %2140 = vmatprep.subr.msk.mxu0 %vm391_vm9, %v310_v35 }
 0x111   : > { %v288_v37 = vpop.permute.xlu1 %287 }
 0x112   : > { %v294_v39 = vsel %vm293_vm11, %v288_v37, %v290_v30 }
 0x113   : > { %v309_v41 = vsel %vm2338_vm0, %v294_v39, %v305_v38  ;;  %v315_v43 = vsel %vm2342_vm1, %v305_v38, %v294_v39  ;;  %v328_v45 = vpop.permute.xlu0 %327 }
 0x114   : > { %2141 = vmatpush1.msk.msra.mxu0 %vm391_vm9, %v309_v41 }
 0x115   : > { %2142 = vmatmul.mubr.msk.f32.vlgmr.msra.gmra.mrb[0].mxu0 %vm387_vm10, %v375_v40  ;;  %2144 = vmatprep.subr.msk.mxu0 %vm391_vm9, %v316_v42  ;;  %v326_v44 = vpop.permute.xlu1 %325 }
 0x116   : > { %2145 = vmatpush1.msk.msra.mxu0 %vm391_vm9, %v315_v43  ;;  %622 = vmatprep.mubr.f32.mxu0 %v2284_v14  ;;  %v331_v46 = vsel %vm329_vm13, %v326_v44, %v328_v45 }
 0x117   : > { %v335_v51 = vpop.permute.xlu0 %334 }
 0x119   : > { %v337_v47 = vpop.permute.xlu1 %336 }
 0x11a   : > { %v342_v48 = vsel %vm340_vm14, %v337_v47, %v339_v36  ;;  %v341_v53 = vsel %vm340_vm14, %v335_v51, %v337_v47 }
 0x11b   : > { %v346_v50 = vsel %vm2346_vm2, %v331_v46, %v342_v48  ;;  %v354_v58 = vpop.permute.xlu0 %353  ;;  %v348_v59 = vsel %vm2350_vm3, %v342_v48, %v331_v46 }
 0x11c   : > { %2148 = vmatprep.subr.msk.mxu0 %vm391_vm9, %v346_v50 }
 0x11d   : > { %2146 = vmatmul.mubr.msk.f32.vlgmr.msra.gmra.mrb[0].mxu0 %vm387_vm10, %v2143_v49  ;;  %v324_v52 = vpop.permute.xlu1 %323 }
 0x11e   : > { %v330_v54 = vsel %vm329_vm13, %v324_v52, %v326_v44  ;;  %706 = vmatprep.mubr.f32.mxu0 %v2284_v14 }
 0x11f   : > { %v345_v55 = vsel %vm2338_vm0, %v330_v54, %v341_v53  ;;  %v365_v61 = vpop.permute.xlu0 %364  ;;  %v347_v0 = vsel %vm2342_vm1, %v341_v53, %v330_v54 }
 0x120   : > { %2149 = vmatpush1.msk.msra.mxu0 %vm391_vm9, %v345_v55 }
 0x121   : > { %v352_v56 = vpop.permute.xlu1 %351  ;;  %2152 = vmatprep.subr.msk.mxu0 %vm391_vm9, %v2377_v19  ;;  %v2159_v19 = vld [vmem:[%s2670_s1 + $0x18] sm:$0xf] }
 0x122   : > { %v357_v1 = vsel %vm355_vm4, %v352_v56, %v354_v58 }
 0x123   : > { %v361_v4 = vpop.permute.xlu0 %360 }
 0x125   : > { %2150 = vmatmul.mubr.msk.f32.vlgmr.msra.gmra.mrb[0].mxu0 %vm387_vm10, %v2147_v57  ;;  %v363_v60 = vpop.permute.xlu1 %362 }
 0x126   : > { %2153 = vmatpush1.msk.msra.mxu0 %vm391_vm9, %v2354_v10  ;;  %790 = vmatprep.mubr.f32.mxu0 %v2284_v14  ;;  %v368_v63 = vsel %vm366_vm15, %v363_v60, %v365_v61  ;;  %v367_v9 = vsel %vm366_vm15, %v361_v4, %v363_v60  ;;  %v2034_v61 = vld [vmem:[%s2673_s4] sm:$0xf]  ;;  %v2171_v4 = vld [vmem:[%s2672_s3 + $0x4] sm:$0xf] }
 0x127   : > { %2156 = vmatprep.subr.msk.mxu0 %vm391_vm9, %v348_v59  ;;  %v372_v3 = vsel %vm2346_vm2, %v357_v1, %v368_v63  ;;  %v974_v16 = vpop.permute.xlu0 %973  ;;  %v374_v21 = vsel %vm2350_vm3, %v368_v63, %v357_v1 }
 0x129   : > { %v350_v2 = vpop.permute.xlu1 %349 }
 0x12a   : > { %v356_v11 = vsel %vm355_vm4, %v350_v2, %v352_v56 }
 0x12b   : > { %v371_v13 = vsel %vm2338_vm0, %v356_v11, %v367_v9  ;;  %v373_v23 = vsel %vm2342_vm1, %v367_v9, %v356_v11 }
 0x12d   : > { %2154 = vmatmul.mubr.msk.f32.vlgmr.msra.gmra.mrb[0].mxu0 %vm387_vm10, %v2151_v62  ;;  %v972_v15 = vpop.permute.xlu1 %971 }
 0x12e   : > { %2157 = vmatpush1.msk.msra.mxu0 %vm391_vm9, %v347_v0  ;;  %874 = vmatprep.mubr.f32.mxu0 %v2284_v14  ;;  %v977_v17 = vsel %vm975_vm5, %v972_v15, %v974_v16 }
 0x12f   : > { %2160 = vmatprep.subr.msk.mxu0 %vm391_vm9, %v372_v3 }
 0x131   : > { %v970_v18 = vpop.permute.xlu1 %969 }
 0x132   : > { %v976_v20 = vsel %vm975_vm5, %v970_v18, %v972_v15 }
 0x135   : > { %2158 = vmatmul.mubr.msk.f32.vlgmr.msra.gmra.mrb[0].mxu0 %vm387_vm10, %v2155_v12 }
 0x136   : > { %2161 = vmatpush1.msk.msra.mxu0 %vm391_vm9, %v371_v13  ;;  %958 = vmatprep.mubr.f32.mxu0 %v2284_v14 }
 0x137   : > { %2164 = vmatprep.subr.msk.mxu0 %vm391_vm9, %v977_v17 }
 0x138   : > { %v1146_v25 = vpop.permute.xlu0 %1145 }
 0x13d   : > { %2162 = vmatmul.mubr.msk.f32.vlgmr.msra.gmra.mrb[0].mxu0 %vm387_vm10, %v2159_v19 }
 0x13e   : > { %2165 = vmatpush1.msk.msra.mxu0 %vm391_vm9, %v976_v20  ;;  %1049 = vmatprep.mubr.f32.mxu0 %v2284_v14 }
 0x13f   : > { %2168 = vmatprep.subr.msk.mxu0 %vm391_vm9, %v374_v21 }
 0x145   : > { %2166 = vmatmul.mubr.msk.f32.vlgmr.msra.gmra.mrb[0].mxu0 %vm387_vm10, %v2163_v22  ;;  %v1271_v22 = vld [vmem:[%s2672_s3] sm:$0xf] }
 0x146   : > { %2169 = vmatpush1.msk.msra.mxu0 %vm391_vm9, %v373_v23  ;;  %1133 = vmatprep.mubr.f32.mxu0 %v2284_v14 }
 0x14d   : > { %2170 = vmatmul.mubr.msk.f32.vlgmr.msra.gmra.mrb[0].mxu0 %vm387_vm10, %v2167_v24 }
 0x220   : > { %v1135_v26 = vpop.f32.mrb[0].mxu0 }
 0x221   : > { %v1148_v27 = vadd.f32 %v1146_v25, %v1135_v26  ;;  %v1137_v28 = vpop.f32.mrb[1].mxu0 }
 0x222   : > { %v1149_v29 = vadd.f32 %v1146_v25, %v1137_v28 }
 0x223   : > { %v1150_v30 = vsel %vm391_vm9, %v1148_v27, 0.0  ;;  %v1156_v31 = vmul.f32 %v1148_v27, %v1148_v27 }
 0x224   : > { %v1151_v32 = vsel %vm391_vm9, %v1149_v29, 0.0  ;;  %v1157_v33 = vmul.f32 %v1149_v29, %v1149_v29 }
 0x225   : > { %v1152_v34 = vadd.f32 %v1151_v32, %v1150_v30  ;;  %v1158_v35 = vsel %vm391_vm9, %v1156_v31, 0.0  ;;  %v2178_v31 = vld [vmem:[%s2672_s3 + $0x8] sm:$0xf] }
 0x226   : > { %v1159_v36 = vsel %vm391_vm9, %v1157_v33, 0.0 }
 0x227   : > { %1153 = vadd.xlane.f32.xlu1 %v1152_v34  ;;  %v1160_v37 = vadd.f32 %v1159_v36, %v1158_v35 }
 0x229   : > { %1161 = vadd.xlane.f32.xlu0 %v1160_v37 }
 0x2b4   : > { %v1154_v38 = vpop.xlane.xlu1 %1153 }
 0x2b5   : > { %v1155_v39 = vmul.f32 0.00390625, %v1154_v38 }
 0x2b6   : > { %v1162_v40 = vpop.xlane.xlu0 %1161 }
 0x2b7   : > { %v1163_v41 = vmul.f32 0.00390625, %v1162_v40  ;;  %v1164_v42 = vmul.f32 %v1155_v39, %v1155_v39  ;;  %v1167_v46 = vsub.f32 %v1148_v27, %v1155_v39  ;;  %v1168_v47 = vsub.f32 %v1149_v29, %v1155_v39  ;;  %v2182_v39 = vld [vmem:[%s2672_s3 + $0xc] sm:$0xf] }
 0x2b9   : > { %v1165_v43 = vsub.f32 %v1163_v41, %v1164_v42 }
 0x2bb   : > { %v1166_v44 = vmax.f32 %v1165_v43, 0.0 }
 0x2bd   : > { %v1169_v45 = vadd.f32 1e-05, %v1166_v44  ;;  %v2186_v44 = vld [vmem:[%s2672_s3 + $0x10] sm:$0xf] }
 0x2bf   : > { %2266 = vrsqrt.f32 %v1169_v45 }
 0x2c9   : > { %v2267_v48 = vpop.eup %2266 }
 0x2ca   : > { %v1172_v49 = vmul.f32 %v2267_v48, %v1168_v47  ;;  %v1171_v50 = vmul.f32 %v2267_v48, %v1167_v46 }
 0x2cc   : > { %v1174_v51 = vmax.f32 %v1172_v49, 0.0  ;;  %v1173_v52 = vmax.f32 %v1171_v50, 0.0 }
 0x2ce   : > { %1184 = vrot.lane.b32.xlu0 %v1174_v51, %s2281_s29  ;;  %1176 = vrot.lane.b32.xlu1 %v1173_v52, %s2280_s28  ;;  %v2514_v53 = vcombine.low %v1173_v52, %v1174_v51  ;;  %v2530_v60 = vcombine.low %v1174_v51, %v1174_v51  ;;  %v2190_v52 = vld [vmem:[%s2672_s3 + $0x14] sm:$0xf] }
 0x2d0   : > { %1183 = vst [vmem:[#allocation2 + $0x4] sm:$0xff] %v2514_v53 }
 0x2d7   : > { %v1189_v54 = vld [vmem:[#allocation2 + $0x8] sm:$0xf] }
 0x2d8   : > { %1197 = vrot.lane.b32.xlu0 %v1189_v54, %s2282_s30  ;;  %1278 = vrot.lane.b32.xlu1 %v1189_v54, %s2283_s6 }
 0x340   : > { %v1185_v55 = vpop.permute.xlu0 %1184  ;;  %v1177_v56 = vpop.permute.xlu1 %1176 }
 0x341   : > { %1187 = vst.msk [vmem:[#allocation2 + $0xc] sm:$0xf] %vm276_vm7, %v1185_v55 }
 0x342   : > { %1179 = vst.msk [vmem:[#allocation2] sm:$0xf] %vm269_vm6, %v1177_v56 }
 0x348   : > { %v1219_v59 = vld [vmem:[#allocation2 + $0xc] sm:$0xf] }
 0x349   : > { %v1188_v57 = vld [vmem:[#allocation2] sm:$0xff] }
 0x34a   : > { %1274 = vrot.lane.b32.xlu0 %v1188_v57, %s2283_s6  ;;  %v1192_v58 = vcombine.high %v1188_v57, %v1188_v57  ;;  %v1198_v62 = vpop.permute.xlu0 %1197  ;;  %v1279_v63 = vpop.permute.xlu1 %1278 }
 0x34c   : > { %1276 = vrot.lane.b32.xlu1 %v1192_v58, %s2283_s6 }
 0x34e   : > { %1207 = vrot.lane.b32.xlu0 %v1189_v54, %s2285_s7 }
 0x350   : > { %1195 = vrot.lane.b32.xlu1 %v1192_v58, %s2282_s30 }
 0x352   : > { %1203 = vrot.lane.b32.xlu0 %v1188_v57, %s2285_s7 }
 0x354   : > { %1205 = vrot.lane.b32.xlu1 %v1192_v58, %s2285_s7 }
 0x356   : > { %1227 = vrot.lane.b32.xlu0 %v1219_v59, %s2287_s9 }
 0x358   : > { %1193 = vrot.lane.b32.xlu1 %v1188_v57, %s2282_s30 }
 0x35a   : > { %1237 = vrot.lane.b32.xlu0 %v1189_v54, %s2286_s8 }
 0x35c   : > { %1225 = vrot.lane.b32.xlu1 %v2530_v60, %s2287_s9 }
 0x35e   : > { %1233 = vrot.lane.b32.xlu0 %v1188_v57, %s2286_s8 }
 0x360   : > { %1235 = vrot.lane.b32.xlu1 %v1192_v58, %s2286_s8  ;;  %v2194_v58 = vld [vmem:[%s2672_s3 + $0x18] sm:$0xf] }
 0x362   : > { %1251 = vrot.lane.b32.xlu0 %v1219_v59, %s2288_s10 }
 0x364   : > { %1223 = vrot.lane.b32.xlu1 %v2514_v53, %s2287_s9 }
 0x366   : > { %1261 = vrot.lane.b32.xlu0 %v1219_v59, %s2289_s11 }
 0x368   : > { %1249 = vrot.lane.b32.xlu1 %v2530_v60, %s2288_s10 }
 0x36a   : > { %1257 = vrot.lane.b32.xlu0 %v2514_v53, %s2289_s11 }
 0x36c   : > { %1259 = vrot.lane.b32.xlu1 %v2530_v60, %s2289_s11 }
 0x36e   : > { %1866 = vrot.lane.b32.xlu0 %v1219_v59, %s2290_s12 }
 0x370   : > { %1247 = vrot.lane.b32.xlu1 %v2514_v53, %s2288_s10 }
 0x372   : > { %2037 = vperm.xlu0 %2263, %v2034_v61  }
 0x374   : > { %1864 = vrot.lane.b32.xlu1 %v2530_v60, %s2290_s12 }
 0x378   : > { %1862 = vrot.lane.b32.xlu1 %v2514_v53, %s2290_s12 }
 0x3bc   : > { %v1275_v0 = vpop.permute.xlu0 %1274 }
 0x3be   : > { %v1277_v1 = vpop.permute.xlu1 %1276 }
 0x3bf   : > { %v1281_v2 = vsel %vm384_vm8, %v1277_v1, %v1279_v63  ;;  %v1280_v3 = vsel %vm384_vm8, %v1275_v0, %v1277_v1 }
 0x3c0   : > { %v1208_v9 = vpop.permute.xlu0 %1207  ;;  %2172 = vmatprep.subr.msk.mxu1 %vm391_vm9, %v1281_v2 }
 0x3c1   : > { %2173 = vmatpush1.msk.msra.mxu1 %vm391_vm9, %v1280_v3 }
 0x3c2   : > { %v1196_v11 = vpop.permute.xlu1 %1195  ;;  %2174 = vmatmul.mubr.msk.f32.vlgmr.msra.gmra.mrb[0].mxu1 %vm387_vm10, %v2171_v4 }
 0x3c3   : > { %1433 = vmatprep.mubr.f32.mxu1 %v2284_v14  ;;  %v1200_v15 = vsel %vm293_vm11, %v1196_v11, %v1198_v62 }
 0x3c4   : > { %v1204_v12 = vpop.permute.xlu0 %1203 }
 0x3c6   : > { %v1206_v13 = vpop.permute.xlu1 %1205 }
 0x3c7   : > { %v1210_v16 = vsel %vm304_vm12, %v1206_v13, %v1208_v9  ;;  %v1209_v20 = vsel %vm304_vm12, %v1204_v12, %v1206_v13 }
 0x3c8   : > { %v1214_v17 = vsel %vm2346_vm2, %v1200_v15, %v1210_v16  ;;  %v1228_v18 = vpop.permute.xlu0 %1227  ;;  %v1216_v24 = vsel %vm2350_vm3, %v1210_v16, %v1200_v15 }
 0x3c9   : > { %2175 = vmatprep.subr.msk.mxu1 %vm391_vm9, %v1214_v17 }
 0x3ca   : > { %v1194_v19 = vpop.permute.xlu1 %1193 }
 0x3cb   : > { %v1199_v21 = vsel %vm293_vm11, %v1194_v19, %v1196_v11 }
 0x3cc   : > { %v1213_v23 = vsel %vm2338_vm0, %v1199_v21, %v1209_v20  ;;  %v1215_v25 = vsel %vm2342_vm1, %v1209_v20, %v1199_v21  ;;  %v1238_v27 = vpop.permute.xlu0 %1237 }
 0x3cd   : > { %2176 = vmatpush1.msk.msra.mxu1 %vm391_vm9, %v1213_v23 }
 0x3ce   : > { %2177 = vmatmul.mubr.msk.f32.vlgmr.msra.gmra.mrb[0].mxu1 %vm387_vm10, %v1271_v22  ;;  %2179 = vmatprep.subr.msk.mxu1 %vm391_vm9, %v1216_v24  ;;  %v1226_v26 = vpop.permute.xlu1 %1225 }
 0x3cf   : > { %2180 = vmatpush1.msk.msra.mxu1 %vm391_vm9, %v1215_v25  ;;  %1515 = vmatprep.mubr.f32.mxu1 %v2284_v14  ;;  %v1230_v29 = vsel %vm329_vm13, %v1226_v26, %v1228_v18 }
 0x3d0   : > { %v1234_v33 = vpop.permute.xlu0 %1233 }
 0x3d2   : > { %v1236_v28 = vpop.permute.xlu1 %1235 }
 0x3d3   : > { %v1240_v30 = vsel %vm340_vm14, %v1236_v28, %v1238_v27  ;;  %v1239_v35 = vsel %vm340_vm14, %v1234_v33, %v1236_v28 }
 0x3d4   : > { %v1244_v32 = vsel %vm2346_vm2, %v1230_v29, %v1240_v30  ;;  %v1252_v40 = vpop.permute.xlu0 %1251  ;;  %v1246_v41 = vsel %vm2350_vm3, %v1240_v30, %v1230_v29 }
 0x3d5   : > { %2183 = vmatprep.subr.msk.mxu1 %vm391_vm9, %v1244_v32 }
 0x3d6   : > { %2181 = vmatmul.mubr.msk.f32.vlgmr.msra.gmra.mrb[0].mxu1 %vm387_vm10, %v2178_v31  ;;  %v1224_v34 = vpop.permute.xlu1 %1223 }
 0x3d7   : > { %v1229_v36 = vsel %vm329_vm13, %v1224_v34, %v1226_v26  ;;  %1599 = vmatprep.mubr.f32.mxu1 %v2284_v14 }
 0x3d8   : > { %v1243_v37 = vsel %vm2338_vm0, %v1229_v36, %v1239_v35  ;;  %v1262_v43 = vpop.permute.xlu0 %1261  ;;  %v1245_v46 = vsel %vm2342_vm1, %v1239_v35, %v1229_v36 }
 0x3d9   : > { %2184 = vmatpush1.msk.msra.mxu1 %vm391_vm9, %v1243_v37 }
 0x3da   : > { %2187 = vmatprep.subr.msk.mxu1 %vm391_vm9, %v2530_v60  ;;  %v1250_v38 = vpop.permute.xlu1 %1249  ;;  %v2198_v60 = vld [vmem:[%s2672_s3 + $0x1c] sm:$0xf] }
 0x3db   : > { %v1254_v47 = vsel %vm355_vm4, %v1250_v38, %v1252_v40 }
 0x3dc   : > { %v1258_v50 = vpop.permute.xlu0 %1257 }
 0x3de   : > { %2185 = vmatmul.mubr.msk.f32.vlgmr.msra.gmra.mrb[0].mxu1 %vm387_vm10, %v2182_v39  ;;  %v1260_v42 = vpop.permute.xlu1 %1259 }
 0x3df   : > { %2188 = vmatpush1.msk.msra.mxu1 %vm391_vm9, %v2514_v53  ;;  %1683 = vmatprep.mubr.f32.mxu1 %v2284_v14  ;;  %v1264_v45 = vsel %vm366_vm15, %v1260_v42, %v1262_v43  ;;  %v1263_v54 = vsel %vm366_vm15, %v1258_v50, %v1260_v42 }
 0x3e0   : > { %2191 = vmatprep.subr.msk.mxu1 %vm391_vm9, %v1246_v41  ;;  %v1268_v49 = vsel %vm2346_vm2, %v1254_v47, %v1264_v45  ;;  %v1867_v55 = vpop.permute.xlu0 %1866  ;;  %v1270_v5 = vsel %vm2350_vm3, %v1264_v45, %v1254_v47 }
 0x3e2   : > { %v1248_v48 = vpop.permute.xlu1 %1247 }
 0x3e3   : > { %v1253_v51 = vsel %vm355_vm4, %v1248_v48, %v1250_v38 }
 0x3e4   : > { %v1267_v7 = vsel %vm2338_vm0, %v1253_v51, %v1263_v54  ;;  %v1269_v61 = vsel %vm2342_vm1, %v1263_v54, %v1253_v51 }
 0x3e6   : > { %2189 = vmatmul.mubr.msk.f32.vlgmr.msra.gmra.mrb[0].mxu1 %vm387_vm10, %v2186_v44  ;;  %v1865_v53 = vpop.permute.xlu1 %1864 }
 0x3e7   : > { %2192 = vmatpush1.msk.msra.mxu1 %vm391_vm9, %v1245_v46  ;;  %1767 = vmatprep.mubr.f32.mxu1 %v2284_v14  ;;  %v1869_v56 = vsel %vm975_vm5, %v1865_v53, %v1867_v55 }
 0x3e8   : > { %2195 = vmatprep.subr.msk.mxu1 %vm391_vm9, %v1268_v49 }
 0x3ea   : > { %v1863_v57 = vpop.permute.xlu1 %1862 }
 0x3eb   : > { %v1868_v59 = vsel %vm975_vm5, %v1863_v57, %v1865_v53 }
 0x3ee   : > { %2193 = vmatmul.mubr.msk.f32.vlgmr.msra.gmra.mrb[0].mxu1 %vm387_vm10, %v2190_v52 }
 0x3ef   : > { %2196 = vmatpush1.msk.msra.mxu1 %vm391_vm9, %v1267_v7  ;;  %1851 = vmatprep.mubr.f32.mxu1 %v2284_v14 }
 0x3f0   : > { %2199 = vmatprep.subr.msk.mxu1 %vm391_vm9, %v1869_v56 }
 0x3f1   : > { %v2038_v62 = vpop.permute.xlu0 %2037 }
 0x3f6   : > { %2197 = vmatmul.mubr.msk.f32.vlgmr.msra.gmra.mrb[0].mxu1 %vm387_vm10, %v2194_v58 }
 0x3f7   : > { %2200 = vmatpush1.msk.msra.mxu1 %vm391_vm9, %v1868_v59  ;;  %1941 = vmatprep.mubr.f32.mxu1 %v2284_v14 }
 0x3f8   : > { %2203 = vmatprep.subr.msk.mxu1 %vm391_vm9, %v1270_v5 }
 0x3fe   : > { %2201 = vmatmul.mubr.msk.f32.vlgmr.msra.gmra.mrb[0].mxu1 %vm387_vm10, %v2198_v60 }
 0x3ff   : > { %2204 = vmatpush1.msk.msra.mxu1 %vm391_vm9, %v1269_v61  ;;  %2025 = vmatprep.mubr.f32.mxu1 %v2284_v14 }
 0x406   : > { %2205 = vmatmul.mubr.msk.f32.vlgmr.msra.gmra.mrb[0].mxu1 %vm387_vm10, %v2202_v8 }
 0x4d9   : > { %v2027_v63 = vpop.f32.mrb[0].mxu1 }
 0x4da   : > { %v2040_v0 = vadd.f32 %v2038_v62, %v2027_v63  ;;  %v2029_v1 = vpop.f32.mrb[1].mxu1 }
 0x4db   : > { %v2041_v2 = vadd.f32 %v2038_v62, %v2029_v1 }
 0x4dc   : > { %v2042_v6 = vsel %vm391_vm9, %v2040_v0, 0.0  ;;  %v2048_v3 = vmul.f32 %v2040_v0, %v2040_v0 }
 0x4dd   : > { %v2043_v4 = vsel %vm391_vm9, %v2041_v2, 0.0  ;;  %v2049_v9 = vmul.f32 %v2041_v2, %v2041_v2 }
 0x4de   : > { %v2044_v11 = vadd.f32 %v2043_v4, %v2042_v6  ;;  %v2050_v14 = vsel %vm391_vm9, %v2048_v3, 0.0 }
 0x4df   : > { %v2051_v12 = vsel %vm391_vm9, %v2049_v9, 0.0 }
 0x4e0   : > { %2045 = vadd.xlane.f32.xlu1 %v2044_v11  ;;  %v2052_v13 = vadd.f32 %v2051_v12, %v2050_v14 }
 0x4e2   : > { %2053 = vadd.xlane.f32.xlu0 %v2052_v13 }
 0x56d   : > { %v2046_v15 = vpop.xlane.xlu1 %2045 }
 0x56e   : > { %v2047_v16 = vmul.f32 0.00390625, %v2046_v15 }
 0x56f   : > { %v2054_v17 = vpop.xlane.xlu0 %2053 }
 0x570   : > { %v2055_v18 = vmul.f32 0.00390625, %v2054_v17  ;;  %v2056_v19 = vmul.f32 %v2047_v16, %v2047_v16  ;;  %v2059_v23 = vsub.f32 %v2040_v0, %v2047_v16  ;;  %v2060_v24 = vsub.f32 %v2041_v2, %v2047_v16 }
 0x572   : > { %v2057_v20 = vsub.f32 %v2055_v18, %v2056_v19 }
 0x574   : > { %v2058_v21 = vmax.f32 %v2057_v20, 0.0 }
 0x576   : > { %v2061_v22 = vadd.f32 1e-05, %v2058_v21 }
 0x578   : > { %2268 = vrsqrt.f32 %v2061_v22 }
 0x582   : > { %v2269_v25 = vpop.eup %2268 }
 0x583   : > { %v2063_v26 = vmul.f32 %v2269_v25, %v2059_v23  ;;  %v2064_v27 = vmul.f32 %v2269_v25, %v2060_v24 }
 0x585   : > { %v2067_v28 = vcombine.low %v2063_v26, %v2064_v27 }
 0x587   : > { %v2069_v29 = vadd.f32 %v2067_v28, %v2354_v10 }
 0x589   : > { %2070 = vst [vmem:[%s2336_s27] sm:$0xff] %v2069_v29 }
 0x58a PF: > { %s15_s18 = sadd.s32 1, %s2277_s18  }
 0x58b   : > { %p12_p5 = scmp.ge.s32.totalorder %s15_s18, 4  }
 0x58d   :  { %14 = sbr.rel (!%p12_p5) target bundleno = 1 (0x1), region = 90 }

// kernel: resnet_block_nchw.1
= control target key start
LH: loop header
LB: loop body
LE: loop exit
PB: predicated region body
PF: predicated region fallthrough
CT: control target
= control target key end

     0   :  { %s2322_s18 = smov 0   ;;  %s2669_s0 = inlined_call_operand.vmem [shape: f32[2,4,256], index: 0, kind: input, shape index: {}]   ;;  %s2670_s1 = inlined_call_operand.vmem [shape: f32[9,4,4], index: 1, kind: input, shape index: {}]   ;;  %s2671_s2 = inlined_call_operand.vmem [shape: f32[4,1], index: 2, kind: input, shape index: {}]   ;;  %s2672_s3 = inlined_call_operand.vmem [shape: f32[9,4,4], index: 3, kind: input, shape index: {}]   ;;  %s2673_s4 = inlined_call_operand.vmem [shape: f32[4,1], index: 4, kind: input, shape index: {}]   ;;  %s2674_s5 = inlined_call_operand.vmem [shape: f32[2,4,256], index: 5, kind: output, shape index: {}]  }
   0x1 LB: > { %s2126_s19 = sadd.s32 4294967295, %s2277_s18   ;;  %p2130_p0 = scmp.ge.s32.totalorder %s2277_s18, 1  ;;  %s2277_s18 = sphi %s2322_s18, %s15_s18  }
   0x2   : > { %p187_p1 = scmp.lt.s32.totalorder %s2277_s18, 3 }
   0x4   : > { %p188_p2 = pnand %p2130_p0, %p187_p1 }
   0x5   : > { %p215_p3 = scmp.lt.s32.totalorder (!%p188_p2), %s2126_s19, 1  ;;  %v225_v0 = vlaneseq (!%p188_p2)  ;;  %p2135_p4 = scmp.ne.s32.totalorder (!%p188_p2), %s2126_s19, 0 }
   0x6   : > { %191 = sbr.rel (%p188_p2) target bundleno = 1418 (0x58a), region = 40 }
   0x7   : > { %v226_v1 = vand.u32 (!%p188_p2), 127, %v225_v0 }
   0x9   : > { %v227_v2 = vadd.s32 (!%p188_p2), 128, %v226_v1  ;;  %v232_v3 = vand.u32 (!%p188_p2), 15, %v226_v1 }
   0xb   : > { %v239_v4 = vand.u32 (!%p188_p2), 15, %v227_v2  ;;  %vm2338_vm0 = vcmp.eq.s32.totalorder (!%p188_p2), %v232_v3, 0  ;;  %vm2342_vm1 = vcmp.eq.s32.totalorder (!%p188_p2), %v232_v3, 15 }
   0xd   : > { %s216_s20 = scalar_select %p215_p3, %s2126_s19, 1  ;;  %vm2346_vm2 = vcmp.eq.s32.totalorder %v239_v4, 0  ;;  %vm2350_vm3 = vcmp.eq.s32.totalorder %v239_v4, 15 }
   0xe   : > { %259 = sbr.rel (%p2135_p4) target bundleno = 21 (0x15), region = 44  ;;  %vm260_vm4 = vcmask (!%p2135_p4), 912384   ;;  %vm262_vm5 = vcmask (!%p2135_p4), 1043584   ;;  %v2279_v9 = vmov (!%p2135_p4), 0.0  }
   0xf   : > { %s2208_s21 = sshll.u32 %s216_s20, 3  ;;  %261 = vst.msk [vmem:[#allocation2] sm:$0xf] (!%p2135_p4), %vm260_vm4, %v2279_v9 }
  0x10   : > { %s219_s24 = scalar_lea.vmem %s2669_s0, %s2208_s21  ;;  %s2336_s27 = scalar_lea.vmem %s2674_s5, %s2208_s21  ;;  %263 = vst.msk [vmem:[#allocation2 + $0xc] sm:$0xf] (!%p2135_p4), %vm262_vm5, %v2279_v9 }
  0x15 PF: > { %v2354_v10 = vld [vmem:[%s219_s24] sm:$0xff]  ;;  %s2280_s28 = smov 96   ;;  %s2281_s29 = smov 32   ;;  %vm269_vm6 = vcmask 1044352   ;;  %vm276_vm7 = vcmask 125952   ;;  %v2284_v14 = vmov 0.0  }
  0x16   : > { %266 = vrot.lane.b32.xlu0 %v2354_v10, %s2280_s28  ;;  %271 = vst [vmem:[#allocation2 + $0x4] sm:$0xff] %v2354_v10  ;;  %s2282_s30 = smov 15   ;;  %s2283_s6 = smov 16   ;;  %460 = vmatprep.mubr.f32.mxu0 %v2284_v14  ;;  %v2377_v19 = vcombine.high %v2354_v10, %v2354_v10  ;;  %v1142_v20 = vld [vmem:[%s2671_s2] sm:$0xf]  ;;  %v2291_v21 = vmov 0  }
  0x17   : > { %1353 = vmatprep.mubr.f32.mxu1 %v2284_v14  ;;  %s2285_s7 = smov 17   ;;  %s2286_s8 = smov 1   ;;  %2263 = vset.pattern.permute.xlu0 %v2291_v21  ;;  %vm384_vm8 = vcmask 130048   ;;  %vm391_vm9 = vcmask 1043456   ;;  %v2136_v28 = vld [vmem:[%s2670_s1 + $0x4] sm:$0xf] }
  0x18   : > { %s2287_s9 = smov 127   ;;  %s2288_s10 = smov 111   ;;  %vm387_vm10 = vcmask 31744   ;;  %vm293_vm11 = vcmask 121856   ;;  %vm304_vm12 = vcmask 138240   ;;  %vm329_vm13 = vcmask 1039360  }
  0x19   : > { %s2289_s11 = smov 113   ;;  %s2290_s12 = smov 112   ;;  %v375_v40 = vld [vmem:[%s2670_s1] sm:$0xf]  ;;  %vm340_vm14 = vcmask 7168   ;;  %vm366_vm15 = vcmask 924672  }
  0x1a   : > { %272 = vrot.lane.b32.xlu0 %v2354_v10, %s2281_s29  ;;  %v2143_v49 = vld [vmem:[%s2670_s1 + $0x8] sm:$0xf]  ;;  %v2147_v57 = vld [vmem:[%s2670_s1 + $0xc] sm:$0xf]  ;;  %vm355_vm4 = vcmask 908288   ;;  %vm975_vm5 = vcmask 916480  }
  0x1b   : > { %v2151_v62 = vld [vmem:[%s2670_s1 + $0x10] sm:$0xf]  ;;  %v2202_v8 = vld [vmem:[%s2672_s3 + $0x20] sm:$0xf] }
  0x1d   : > { %v279_v11 = vld [vmem:[#allocation2 + $0x8] sm:$0xf] }
  0x1e   : > { %291 = vrot.lane.b32.xlu0 %v279_v11, %s2282_s30  ;;  %382 = vrot.lane.b32.xlu1 %v279_v11, %s2283_s6 }
  0x88   : > { %v267_v12 = vpop.permute.xlu0 %266 }
  0x89   : > { %270 = vst.msk [vmem:[#allocation2] sm:$0xf] %vm269_vm6, %v267_v12  ;;  %v2155_v12 = vld [vmem:[%s2670_s1 + $0x14] sm:$0xf] }
  0x8c   : > { %v273_v13 = vpop.permute.xlu0 %272 }
  0x8d   : > { %v274_v15 = vrot.slane %v273_v13, 4 }
  0x8f   : > { %277 = vst.msk [vmem:[#allocation2 + $0xc] sm:$0xf] %vm276_vm7, %v274_v15 }
  0x90   : > { %v278_v16 = vld [vmem:[#allocation2] sm:$0xff]  ;;  %v292_v22 = vpop.permute.xlu0 %291  ;;  %v383_v23 = vpop.permute.xlu1 %382 }
  0x91   : > { %378 = vrot.lane.b32.xlu0 %v278_v16, %s2283_s6  ;;  %v286_v17 = vcombine.high %v278_v16, %v278_v16 }
  0x93   : > { %380 = vrot.lane.b32.xlu1 %v286_v17, %s2283_s6 }
  0x95   : > { %302 = vrot.lane.b32.xlu0 %v279_v11, %s2285_s7 }
  0x96   : > { %v319_v18 = vld [vmem:[#allocation2 + $0xc] sm:$0xf] }
  0x97   : > { %289 = vrot.lane.b32.xlu1 %v286_v17, %s2282_s30 }
  0x99   : > { %298 = vrot.lane.b32.xlu0 %v278_v16, %s2285_s7 }
  0x9b   : > { %300 = vrot.lane.b32.xlu1 %v286_v17, %s2285_s7 }
  0x9d   : > { %338 = vrot.lane.b32.xlu0 %v279_v11, %s2286_s8 }
  0x9f   : > { %287 = vrot.lane.b32.xlu1 %v278_v16, %s2282_s30 }
  0xa1   : > { %327 = vrot.lane.b32.xlu0 %v319_v18, %s2287_s9 }
  0xa3   : > { %325 = vrot.lane.b32.xlu1 %v2377_v19, %s2287_s9 }
  0xa5   : > { %334 = vrot.lane.b32.xlu0 %v278_v16, %s2286_s8 }
  0xa7   : > { %336 = vrot.lane.b32.xlu1 %v286_v17, %s2286_s8 }
  0xa9   : > { %353 = vrot.lane.b32.xlu0 %v319_v18, %s2288_s10 }
  0xab   : > { %323 = vrot.lane.b32.xlu1 %v2354_v10, %s2287_s9 }
  0xad   : > { %364 = vrot.lane.b32.xlu0 %v319_v18, %s2289_s11 }
  0xaf   : > { %351 = vrot.lane.b32.xlu1 %v2377_v19, %s2288_s10 }
  0xb1   : > { %360 = vrot.lane.b32.xlu0 %v2354_v10, %s2289_s11 }
  0xb3   : > { %362 = vrot.lane.b32.xlu1 %v2377_v19, %s2289_s11 }
  0xb5   : > { %973 = vrot.lane.b32.xlu0 %v319_v18, %s2290_s12 }
  0xb7   : > { %349 = vrot.lane.b32.xlu1 %v2354_v10, %s2288_s10 }
  0xb9   : > { %1145 = vperm.xlu0 %2263, %v1142_v20  }
  0xbb   : > { %971 = vrot.lane.b32.xlu1 %v2377_v19, %s2290_s12 }
  0xbf   : > { %969 = vrot.lane.b32.xlu1 %v2354_v10, %s2290_s12 }
 0x103   : > { %v379_v24 = vpop.permute.xlu0 %378 }
 0x105   : > { %v381_v25 = vpop.permute.xlu1 %380 }
 0x106   : > { %v386_v26 = vsel %vm384_vm8, %v381_v25, %v383_v23  ;;  %v385_v27 = vsel %vm384_vm8, %v379_v24, %v381_v25  ;;  %v2167_v24 = vld [vmem:[%s2670_s1 + $0x20] sm:$0xf] }
 0x107   : > { %v303_v29 = vpop.permute.xlu0 %302  ;;  %2137 = vmatprep.subr.msk.mxu0 %vm391_vm9, %v386_v26 }
 0x108   : > { %2138 = vmatpush1.msk.msra.mxu0 %vm391_vm9, %v385_v27 }
 0x109   : > { %v290_v30 = vpop.permute.xlu1 %289  ;;  %2139 = vmatmul.mubr.msk.f32.vlgmr.msra.gmra.mrb[0].mxu0 %vm387_vm10, %v2136_v28 }
 0x10a   : > { %540 = vmatprep.mubr.f32.mxu0 %v2284_v14  ;;  %v295_v33 = vsel %vm293_vm11, %v290_v30, %v292_v22  ;;  %v2163_v22 = vld [vmem:[%s2670_s1 + $0x1c] sm:$0xf] }
 0x10b   : > { %v299_v31 = vpop.permute.xlu0 %298 }
 0x10d   : > { %v301_v32 = vpop.permute.xlu1 %300 }
 0x10e   : > { %v306_v34 = vsel %vm304_vm12, %v301_v32, %v303_v29  ;;  %v305_v38 = vsel %vm304_vm12, %v299_v31, %v301_v32 }
 0x10f   : > { %v310_v35 = vsel %vm2346_vm2, %v295_v33, %v306_v34  ;;  %v339_v36 = vpop.permute.xlu0 %338  ;;  %v316_v42 = vsel %vm2350_vm3, %v306_v34, %v295_v33 }
 0x110   : > { %2140 = vmatprep.subr.msk.mxu0 %vm391_vm9, %v310_v35 }
 0x111   : > { %v288_v37 = vpop.permute.xlu1 %287 }
 0x112   : > { %v294_v39 = vsel %vm293_vm11, %v288_v37, %v290_v30 }
 0x113   : > { %v309_v41 = vsel %vm2338_vm0, %v294_v39, %v305_v38  ;;  %v315_v43 = vsel %vm2342_vm1, %v305_v38, %v294_v39  ;;  %v328_v45 = vpop.permute.xlu0 %327 }
 0x114   : > { %2141 = vmatpush1.msk.msra.mxu0 %vm391_vm9, %v309_v41 }
 0x115   : > { %2142 = vmatmul.mubr.msk.f32.vlgmr.msra.gmra.mrb[0].mxu0 %vm387_vm10, %v375_v40  ;;  %2144 = vmatprep.subr.msk.mxu0 %vm391_vm9, %v316_v42  ;;  %v326_v44 = vpop.permute.xlu1 %325 }
 0x116   : > { %2145 = vmatpush1.msk.msra.mxu0 %vm391_vm9, %v315_v43  ;;  %622 = vmatprep.mubr.f32.mxu0 %v2284_v14  ;;  %v331_v46 = vsel %vm329_vm13, %v326_v44, %v328_v45 }
 0x117   : > { %v335_v51 = vpop.permute.xlu0 %334 }
 0x119   : > { %v337_v47 = vpop.permute.xlu1 %336 }
 0x11a   : > { %v342_v48 = vsel %vm340_vm14, %v337_v47, %v339_v36  ;;  %v341_v53 = vsel %vm340_vm14, %v335_v51, %v337_v47 }
 0x11b   : > { %v346_v50 = vsel %vm2346_vm2, %v331_v46, %v342_v48  ;;  %v354_v58 = vpop.permute.xlu0 %353  ;;  %v348_v59 = vsel %vm2350_vm3, %v342_v48, %v331_v46 }
 0x11c   : > { %2148 = vmatprep.subr.msk.mxu0 %vm391_vm9, %v346_v50 }
 0x11d   : > { %2146 = vmatmul.mubr.msk.f32.vlgmr.msra.gmra.mrb[0].mxu0 %vm387_vm10, %v2143_v49  ;;  %v324_v52 = vpop.permute.xlu1 %323 }
 0x11e   : > { %v330_v54 = vsel %vm329_vm13, %v324_v52, %v326_v44  ;;  %706 = vmatprep.mubr.f32.mxu0 %v2284_v14 }
 0x11f   : > { %v345_v55 = vsel %vm2338_vm0, %v330_v54, %v341_v53  ;;  %v365_v61 = vpop.permute.xlu0 %364  ;;  %v347_v0 = vsel %vm2342_vm1, %v341_v53, %v330_v54 }
 0x120   : > { %2149 = vmatpush1.msk.msra.mxu0 %vm391_vm9, %v345_v55 }
 0x121   : > { %v352_v56 = vpop.permute.xlu1 %351  ;;  %2152 = vmatprep.subr.msk.mxu0 %vm391_vm9, %v2377_v19  ;;  %v2159_v19 = vld [vmem:[%s2670_s1 + $0x18] sm:$0xf] }
 0x122   : > { %v357_v1 = vsel %vm355_vm4, %v352_v56, %v354_v58 }
 0x123   : > { %v361_v4 = vpop.permute.xlu0 %360 }
 0x125   : > { %2150 = vmatmul.mubr.msk.f32.vlgmr.msra.gmra.mrb[0].mxu0 %vm387_vm10, %v2147_v57  ;;  %v363_v60 = vpop.permute.xlu1 %362 }
 0x126   : > { %2153 = vmatpush1.msk.msra.mxu0 %vm391_vm9, %v2354_v10  ;;  %790 = vmatprep.mubr.f32.mxu0 %v2284_v14  ;;  %v368_v63 = vsel %vm366_vm15, %v363_v60, %v365_v61  ;;  %v367_v9 = vsel %vm366_vm15, %v361_v4, %v363_v60  ;;  %v2034_v61 = vld [vmem:[%s2673_s4] sm:$0xf]  ;;  %v2171_v4 = vld [vmem:[%s2672_s3 + $0x4] sm:$0xf] }
 0x127   : > { %2156 = vmatprep.subr.msk.mxu0 %vm391_vm9, %v348_v59  ;;  %v372_v3 = vsel %vm2346_vm2, %v357_v1, %v368_v63  ;;  %v974_v16 = vpop.permute.xlu0 %973  ;;  %v374_v21 = vsel %vm2350_vm3, %v368_v63, %v357_v1 }
 0x129   : > { %v350_v2 = vpop.permute.xlu1 %349 }
 0x12a   : > { %v356_v11 = vsel %vm355_vm4, %v350_v2, %v352_v56 }
 0x12b   : > { %v371_v13 = vsel %vm2338_vm0, %v356_v11, %v367_v9  ;;  %v373_v23 = vsel %vm2342_vm1, %v367_v9, %v356_v11 }
 0x12d   : > { %2154 = vmatmul.mubr.msk.f32.vlgmr.msra.gmra.mrb[0].mxu0 %vm387_vm10, %v2151_v62  ;;  %v972_v15 = vpop.permute.xlu1 %971 }
 0x12e   : > { %2157 = vmatpush1.msk.msra.mxu0 %vm391_vm9, %v347_v0  ;;  %874 = vmatprep.mubr.f32.mxu0 %v2284_v14  ;;  %v977_v17 = vsel %vm975_vm5, %v972_v15, %v974_v16 }
 0x12f   : > { %2160 = vmatprep.subr.msk.mxu0 %vm391_vm9, %v372_v3 }
 0x131   : > { %v970_v18 = vpop.permute.xlu1 %969 }
 0x132   : > { %v976_v20 = vsel %vm975_vm5, %v970_v18, %v972_v15 }
 0x135   : > { %2158 = vmatmul.mubr.msk.f32.vlgmr.msra.gmra.mrb[0].mxu0 %vm387_vm10, %v2155_v12 }
 0x136   : > { %2161 = vmatpush1.msk.msra.mxu0 %vm391_vm9, %v371_v13  ;;  %958 = vmatprep.mubr.f32.mxu0 %v2284_v14 }
 0x137   : > { %2164 = vmatprep.subr.msk.mxu0 %vm391_vm9, %v977_v17 }
 0x138   : > { %v1146_v25 = vpop.permute.xlu0 %1145 }
 0x13d   : > { %2162 = vmatmul.mubr.msk.f32.vlgmr.msra.gmra.mrb[0].mxu0 %vm387_vm10, %v2159_v19 }
 0x13e   : > { %2165 = vmatpush1.msk.msra.mxu0 %vm391_vm9, %v976_v20  ;;  %1049 = vmatprep.mubr.f32.mxu0 %v2284_v14 }
 0x13f   : > { %2168 = vmatprep.subr.msk.mxu0 %vm391_vm9, %v374_v21 }
 0x145   : > { %2166 = vmatmul.mubr.msk.f32.vlgmr.msra.gmra.mrb[0].mxu0 %vm387_vm10, %v2163_v22  ;;  %v1271_v22 = vld [vmem:[%s2672_s3] sm:$0xf] }
 0x146   : > { %2169 = vmatpush1.msk.msra.mxu0 %vm391_vm9, %v373_v23  ;;  %1133 = vmatprep.mubr.f32.mxu0 %v2284_v14 }
 0x14d   : > { %2170 = vmatmul.mubr.msk.f32.vlgmr.msra.gmra.mrb[0].mxu0 %vm387_vm10, %v2167_v24 }
 0x220   : > { %v1135_v26 = vpop.f32.mrb[0].mxu0 }
 0x221   : > { %v1148_v27 = vadd.f32 %v1146_v25, %v1135_v26  ;;  %v1137_v28 = vpop.f32.mrb[1].mxu0 }
 0x222   : > { %v1149_v29 = vadd.f32 %v1146_v25, %v1137_v28 }
 0x223   : > { %v1150_v30 = vsel %vm391_vm9, %v1148_v27, 0.0  ;;  %v1156_v31 = vmul.f32 %v1148_v27, %v1148_v27 }
 0x224   : > { %v1151_v32 = vsel %vm391_vm9, %v1149_v29, 0.0  ;;  %v1157_v33 = vmul.f32 %v1149_v29, %v1149_v29 }
 0x225   : > { %v1152_v34 = vadd.f32 %v1151_v32, %v1150_v30  ;;  %v1158_v35 = vsel %vm391_vm9, %v1156_v31, 0.0  ;;  %v2178_v31 = vld [vmem:[%s2672_s3 + $0x8] sm:$0xf] }
 0x226   : > { %v1159_v36 = vsel %vm391_vm9, %v1157_v33, 0.0 }
 0x227   : > { %1153 = vadd.xlane.f32.xlu1 %v1152_v34  ;;  %v1160_v37 = vadd.f32 %v1159_v36, %v1158_v35 }
 0x229   : > { %1161 = vadd.xlane.f32.xlu0 %v1160_v37 }
 0x2b4   : > { %v1154_v38 = vpop.xlane.xlu1 %1153 }
 0x2b5   : > { %v1155_v39 = vmul.f32 0.00390625, %v1154_v38 }
 0x2b6   : > { %v1162_v40 = vpop.xlane.xlu0 %1161 }
 0x2b7   : > { %v1163_v41 = vmul.f32 0.00390625, %v1162_v40  ;;  %v1164_v42 = vmul.f32 %v1155_v39, %v1155_v39  ;;  %v1167_v46 = vsub.f32 %v1148_v27, %v1155_v39  ;;  %v1168_v47 = vsub.f32 %v1149_v29, %v1155_v39  ;;  %v2182_v39 = vld [vmem:[%s2672_s3 + $0xc] sm:$0xf] }
 0x2b9   : > { %v1165_v43 = vsub.f32 %v1163_v41, %v1164_v42 }
 0x2bb   : > { %v1166_v44 = vmax.f32 %v1165_v43, 0.0 }
 0x2bd   : > { %v1169_v45 = vadd.f32 1e-05, %v1166_v44  ;;  %v2186_v44 = vld [vmem:[%s2672_s3 + $0x10] sm:$0xf] }
 0x2bf   : > { %2266 = vrsqrt.f32 %v1169_v45 }
 0x2c9   : > { %v2267_v48 = vpop.eup %2266 }
 0x2ca   : > { %v1172_v49 = vmul.f32 %v2267_v48, %v1168_v47  ;;  %v1171_v50 = vmul.f32 %v2267_v48, %v1167_v46 }
 0x2cc   : > { %v1174_v51 = vmax.f32 %v1172_v49, 0.0  ;;  %v1173_v52 = vmax.f32 %v1171_v50, 0.0 }
 0x2ce   : > { %1184 = vrot.lane.b32.xlu0 %v1174_v51, %s2281_s29  ;;  %1176 = vrot.lane.b32.xlu1 %v1173_v52, %s2280_s28  ;;  %v2514_v53 = vcombine.low %v1173_v52, %v1174_v51  ;;  %v2530_v60 = vcombine.low %v1174_v51, %v1174_v51  ;;  %v2190_v52 = vld [vmem:[%s2672_s3 + $0x14] sm:$0xf] }
 0x2d0   : > { %1183 = vst [vmem:[#allocation2 + $0x4] sm:$0xff] %v2514_v53 }
 0x2d7   : > { %v1189_v54 = vld [vmem:[#allocation2 + $0x8] sm:$0xf] }
 0x2d8   : > { %1197 = vrot.lane.b32.xlu0 %v1189_v54, %s2282_s30  ;;  %1278 = vrot.lane.b32.xlu1 %v1189_v54, %s2283_s6 }
 0x340   : > { %v1185_v55 = vpop.permute.xlu0 %1184  ;;  %v1177_v56 = vpop.permute.xlu1 %1176 }
 0x341   : > { %1187 = vst.msk [vmem:[#allocation2 + $0xc] sm:$0xf] %vm276_vm7, %v1185_v55 }
 0x342   : > { %1179 = vst.msk [vmem:[#allocation2] sm:$0xf] %vm269_vm6, %v1177_v56 }
 0x348   : > { %v1219_v59 = vld [vmem:[#allocation2 + $0xc] sm:$0xf] }
 0x349   : > { %v1188_v57 = vld [vmem:[#allocation2] sm:$0xff] }
 0x34a   : > { %1274 = vrot.lane.b32.xlu0 %v1188_v57, %s2283_s6  ;;  %v1192_v58 = vcombine.high %v1188_v57, %v1188_v57  ;;  %v1198_v62 = vpop.permute.xlu0 %1197  ;;  %v1279_v63 = vpop.permute.xlu1 %1278 }
 0x34c   : > { %1276 = vrot.lane.b32.xlu1 %v1192_v58, %s2283_s6 }
 0x34e   : > { %1207 = vrot.lane.b32.xlu0 %v1189_v54, %s2285_s7 }
 0x350   : > { %1195 = vrot.lane.b32.xlu1 %v1192_v58, %s2282_s30 }
 0x352   : > { %1203 = vrot.lane.b32.xlu0 %v1188_v57, %s2285_s7 }
 0x354   : > { %1205 = vrot.lane.b32.xlu1 %v1192_v58, %s2285_s7 }
 0x356   : > { %1227 = vrot.lane.b32.xlu0 %v1219_v59, %s2287_s9 }
 0x358   : > { %1193 = vrot.lane.b32.xlu1 %v1188_v57, %s2282_s30 }
 0x35a   : > { %1237 = vrot.lane.b32.xlu0 %v1189_v54, %s2286_s8 }
 0x35c   : > { %1225 = vrot.lane.b32.xlu1 %v2530_v60, %s2287_s9 }
 0x35e   : > { %1233 = vrot.lane.b32.xlu0 %v1188_v57, %s2286_s8 }
 0x360   : > { %1235 = vrot.lane.b32.xlu1 %v1192_v58, %s2286_s8  ;;  %v2194_v58 = vld [vmem:[%s2672_s3 + $0x18] sm:$0xf] }
 0x362   : > { %1251 = vrot.lane.b32.xlu0 %v1219_v59, %s2288_s10 }
 0x364   : > { %1223 = vrot.lane.b32.xlu1 %v2514_v53, %s2287_s9 }
 0x366   : > { %1261 = vrot.lane.b32.xlu0 %v1219_v59, %s2289_s11 }
 0x368   : > { %1249 = vrot.lane.b32.xlu1 %v2530_v60, %s2288_s10 }
 0x36a   : > { %1257 = vrot.lane.b32.xlu0 %v2514_v53, %s2289_s11 }
 0x36c   : > { %1259 = vrot.lane.b32.xlu1 %v2530_v60, %s2289_s11 }
 0x36e   : > { %1866 = vrot.lane.b32.xlu0 %v1219_v59, %s2290_s12 }
 0x370   : > { %1247 = vrot.lane.b32.xlu1 %v2514_v53, %s2288_s10 }
 0x372   : > { %2037 = vperm.xlu0 %2263, %v2034_v61  }
 0x374   : > { %1864 = vrot.lane.b32.xlu1 %v2530_v60, %s2290_s12 }
 0x378   : > { %1862 = vrot.lane.b32.xlu1 %v2514_v53, %s2290_s12 }
 0x3bc   : > { %v1275_v0 = vpop.permute.xlu0 %1274 }
 0x3be   : > { %v1277_v1 = vpop.permute.xlu1 %1276 }
 0x3bf   : > { %v1281_v2 = vsel %vm384_vm8, %v1277_v1, %v1279_v63  ;;  %v1280_v3 = vsel %vm384_vm8, %v1275_v0, %v1277_v1 }
 0x3c0   : > { %v1208_v9 = vpop.permute.xlu0 %1207  ;;  %2172 = vmatprep.subr.msk.mxu1 %vm391_vm9, %v1281_v2 }
 0x3c1   : > { %2173 = vmatpush1.msk.msra.mxu1 %vm391_vm9, %v1280_v3 }
 0x3c2   : > { %v1196_v11 = vpop.permute.xlu1 %1195  ;;  %2174 = vmatmul.mubr.msk.f32.vlgmr.msra.gmra.mrb[0].mxu1 %vm387_vm10, %v2171_v4 }
 0x3c3   : > { %1433 = vmatprep.mubr.f32.mxu1 %v2284_v14  ;;  %v1200_v15 = vsel %vm293_vm11, %v1196_v11, %v1198_v62 }
 0x3c4   : > { %v1204_v12 = vpop.permute.xlu0 %1203 }
 0x3c6   : > { %v1206_v13 = vpop.permute.xlu1 %1205 }
 0x3c7   : > { %v1210_v16 = vsel %vm304_vm12, %v1206_v13, %v1208_v9  ;;  %v1209_v20 = vsel %vm304_vm12, %v1204_v12, %v1206_v13 }
 0x3c8   : > { %v1214_v17 = vsel %vm2346_vm2, %v1200_v15, %v1210_v16  ;;  %v1228_v18 = vpop.permute.xlu0 %1227  ;;  %v1216_v24 = vsel %vm2350_vm3, %v1210_v16, %v1200_v15 }
 0x3c9   : > { %2175 = vmatprep.subr.msk.mxu1 %vm391_vm9, %v1214_v17 }
 0x3ca   : > { %v1194_v19 = vpop.permute.xlu1 %1193 }
 0x3cb   : > { %v1199_v21 = vsel %vm293_vm11, %v1194_v19, %v1196_v11 }
 0x3cc   : > { %v1213_v23 = vsel %vm2338_vm0, %v1199_v21, %v1209_v20  ;;  %v1215_v25 = vsel %vm2342_vm1, %v1209_v20, %v1199_v21  ;;  %v1238_v27 = vpop.permute.xlu0 %1237 }
 0x3cd   : > { %2176 = vmatpush1.msk.msra.mxu1 %vm391_vm9, %v1213_v23 }
 0x3ce   : > { %2177 = vmatmul.mubr.msk.f32.vlgmr.msra.gmra.mrb[0].mxu1 %vm387_vm10, %v1271_v22  ;;  %2179 = vmatprep.subr.msk.mxu1 %vm391_vm9, %v1216_v24  ;;  %v1226_v26 = vpop.permute.xlu1 %1225 }
 0x3cf   : > { %2180 = vmatpush1.msk.msra.mxu1 %vm391_vm9, %v1215_v25  ;;  %1515 = vmatprep.mubr.f32.mxu1 %v2284_v14  ;;  %v1230_v29 = vsel %vm329_vm13, %v1226_v26, %v1228_v18 }
 0x3d0   : > { %v1234_v33 = vpop.permute.xlu0 %1233 }
 0x3d2   : > { %v1236_v28 = vpop.permute.xlu1 %1235 }
 0x3d3   : > { %v1240_v30 = vsel %vm340_vm14, %v1236_v28, %v1238_v27  ;;  %v1239_v35 = vsel %vm340_vm14, %v1234_v33, %v1236_v28 }
 0x3d4   : > { %v1244_v32 = vsel %vm2346_vm2, %v1230_v29, %v1240_v30  ;;  %v1252_v40 = vpop.permute.xlu0 %1251  ;;  %v1246_v41 = vsel %vm2350_vm3, %v1240_v30, %v1230_v29 }
 0x3d5   : > { %2183 = vmatprep.subr.msk.mxu1 %vm391_vm9, %v1244_v32 }
 0x3d6   : > { %2181 = vmatmul.mubr.msk.f32.vlgmr.msra.gmra.mrb[0].mxu1 %vm387_vm10, %v2178_v31  ;;  %v1224_v34 = vpop.permute.xlu1 %1223 }
 0x3d7   : > { %v1229_v36 = vsel %vm329_vm13, %v1224_v34, %v1226_v26  ;;  %1599 = vmatprep.mubr.f32.mxu1 %v2284_v14 }
 0x3d8   : > { %v1243_v37 = vsel %vm2338_vm0, %v1229_v36, %v1239_v35  ;;  %v1262_v43 = vpop.permute.xlu0 %1261  ;;  %v1245_v46 = vsel %vm2342_vm1, %v1239_v35, %v1229_v36 }
 0x3d9   : > { %2184 = vmatpush1.msk.msra.mxu1 %vm391_vm9, %v1243_v37 }
 0x3da   : > { %2187 = vmatprep.subr.msk.mxu1 %vm391_vm9, %v2530_v60  ;;  %v1250_v38 = vpop.permute.xlu1 %1249  ;;  %v2198_v60 = vld [vmem:[%s2672_s3 + $0x1c] sm:$0xf] }
 0x3db   : > { %v1254_v47 = vsel %vm355_vm4, %v1250_v38, %v1252_v40 }
 0x3dc   : > { %v1258_v50 = vpop.permute.xlu0 %1257 }
 0x3de   : > { %2185 = vmatmul.mubr.msk.f32.vlgmr.msra.gmra.mrb[0].mxu1 %vm387_vm10, %v2182_v39  ;;  %v1260_v42 = vpop.permute.xlu1 %1259 }
 0x3df   : > { %2188 = vmatpush1.msk.msra.mxu1 %vm391_vm9, %v2514_v53  ;;  %1683 = vmatprep.mubr.f32.mxu1 %v2284_v14  ;;  %v1264_v45 = vsel %vm366_vm15, %v1260_v42, %v1262_v43  ;;  %v1263_v54 = vsel %vm366_vm15, %v1258_v50, %v1260_v42 }
 0x3e0   : > { %2191 = vmatprep.subr.msk.mxu1 %vm391_vm9, %v1246_v41  ;;  %v1268_v49 = vsel %vm2346_vm2, %v1254_v47, %v1264_v45  ;;  %v1867_v55 = vpop.permute.xlu0 %1866  ;;  %v1270_v5 = vsel %vm2350_vm3, %v1264_v45, %v1254_v47 }
 0x3e2   : > { %v1248_v48 = vpop.permute.xlu1 %1247 }
 0x3e3   : > { %v1253_v51 = vsel %vm355_vm4, %v1248_v48, %v1250_v38 }
 0x3e4   : > { %v1267_v7 = vsel %vm2338_vm0, %v1253_v51, %v1263_v54  ;;  %v1269_v61 = vsel %vm2342_vm1, %v1263_v54, %v1253_v51 }
 0x3e6   : > { %2189 = vmatmul.mubr.msk.f32.vlgmr.msra.gmra.mrb[0].mxu1 %vm387_vm10, %v2186_v44  ;;  %v1865_v53 = vpop.permute.xlu1 %1864 }
 0x3e7   : > { %2192 = vmatpush1.msk.msra.mxu1 %vm391_vm9, %v1245_v46  ;;  %1767 = vmatprep.mubr.f32.mxu1 %v2284_v14  ;;  %v1869_v56 = vsel %vm975_vm5, %v1865_v53, %v1867_v55 }
 0x3e8   : > { %2195 = vmatprep.subr.msk.mxu1 %vm391_vm9, %v1268_v49 }
 0x3ea   : > { %v1863_v57 = vpop.permute.xlu1 %1862 }
 0x3eb   : > { %v1868_v59 = vsel %vm975_vm5, %v1863_v57, %v1865_v53 }
 0x3ee   : > { %2193 = vmatmul.mubr.msk.f32.vlgmr.msra.gmra.mrb[0].mxu1 %vm387_vm10, %v2190_v52 }
 0x3ef   : > { %2196 = vmatpush1.msk.msra.mxu1 %vm391_vm9, %v1267_v7  ;;  %1851 = vmatprep.mubr.f32.mxu1 %v2284_v14 }
 0x3f0   : > { %2199 = vmatprep.subr.msk.mxu1 %vm391_vm9, %v1869_v56 }
 0x3f1   : > { %v2038_v62 = vpop.permute.xlu0 %2037 }
 0x3f6   : > { %2197 = vmatmul.mubr.msk.f32.vlgmr.msra.gmra.mrb[0].mxu1 %vm387_vm10, %v2194_v58 }
 0x3f7   : > { %2200 = vmatpush1.msk.msra.mxu1 %vm391_vm9, %v1868_v59  ;;  %1941 = vmatprep.mubr.f32.mxu1 %v2284_v14 }
 0x3f8   : > { %2203 = vmatprep.subr.msk.mxu1 %vm391_vm9, %v1270_v5 }
 0x3fe   : > { %2201 = vmatmul.mubr.msk.f32.vlgmr.msra.gmra.mrb[0].mxu1 %vm387_vm10, %v2198_v60 }
 0x3ff   : > { %2204 = vmatpush1.msk.msra.mxu1 %vm391_vm9, %v1269_v61  ;;  %2025 = vmatprep.mubr.f32.mxu1 %v2284_v14 }
 0x406   : > { %2205 = vmatmul.mubr.msk.f32.vlgmr.msra.gmra.mrb[0].mxu1 %vm387_vm10, %v2202_v8 }
 0x4d9   : > { %v2027_v63 = vpop.f32.mrb[0].mxu1 }
 0x4da   : > { %v2040_v0 = vadd.f32 %v2038_v62, %v2027_v63  ;;  %v2029_v1 = vpop.f32.mrb[1].mxu1 }
 0x4db   : > { %v2041_v2 = vadd.f32 %v2038_v62, %v2029_v1 }
 0x4dc   : > { %v2042_v6 = vsel %vm391_vm9, %v2040_v0, 0.0  ;;  %v2048_v3 = vmul.f32 %v2040_v0, %v2040_v0 }
 0x4dd   : > { %v2043_v4 = vsel %vm391_vm9, %v2041_v2, 0.0  ;;  %v2049_v9 = vmul.f32 %v2041_v2, %v2041_v2 }
 0x4de   : > { %v2044_v11 = vadd.f32 %v2043_v4, %v2042_v6  ;;  %v2050_v14 = vsel %vm391_vm9, %v2048_v3, 0.0 }
 0x4df   : > { %v2051_v12 = vsel %vm391_vm9, %v2049_v9, 0.0 }
 0x4e0   : > { %2045 = vadd.xlane.f32.xlu1 %v2044_v11  ;;  %v2052_v13 = vadd.f32 %v2051_v12, %v2050_v14 }
 0x4e2   : > { %2053 = vadd.xlane.f32.xlu0 %v2052_v13 }
 0x56d   : > { %v2046_v15 = vpop.xlane.xlu1 %2045 }
 0x56e   : > { %v2047_v16 = vmul.f32 0.00390625, %v2046_v15 }
 0x56f   : > { %v2054_v17 = vpop.xlane.xlu0 %2053 }
 0x570   : > { %v2055_v18 = vmul.f32 0.00390625, %v2054_v17  ;;  %v2056_v19 = vmul.f32 %v2047_v16, %v2047_v16  ;;  %v2059_v23 = vsub.f32 %v2040_v0, %v2047_v16  ;;  %v2060_v24 = vsub.f32 %v2041_v2, %v2047_v16 }
 0x572   : > { %v2057_v20 = vsub.f32 %v2055_v18, %v2056_v19 }
 0x574   : > { %v2058_v21 = vmax.f32 %v2057_v20, 0.0 }
 0x576   : > { %v2061_v22 = vadd.f32 1e-05, %v2058_v21 }
 0x578   : > { %2268 = vrsqrt.f32 %v2061_v22 }
 0x582   : > { %v2269_v25 = vpop.eup %2268 }
 0x583   : > { %v2063_v26 = vmul.f32 %v2269_v25, %v2059_v23  ;;  %v2064_v27 = vmul.f32 %v2269_v25, %v2060_v24 }
 0x585   : > { %v2067_v28 = vcombine.low %v2063_v26, %v2064_v27 }
 0x587   : > { %v2069_v29 = vadd.f32 %v2067_v28, %v2354_v10 }
 0x589   : > { %2070 = vst [vmem:[%s2336_s27] sm:$0xff] %v2069_v29 }
 0x58a PF: > { %s15_s18 = sadd.s32 1, %s2277_s18  }
 0x58b   : > { %p12_p5 = scmp.ge.s32.totalorder %s15_s18, 4  }
 0x58d   :  { %14 = sbr.rel (!%p12_p5) target bundleno = 1 (0x1), region = 90 }

</bundles_post_ra>
